<compile_context>
chip_gen: v5e
topology: v5e:2x2
jax: 0.10.0
libtpu: 0.0.40
codegen_flags: <defaults>
</compile_context>

<pallas_src>
import functools

import jax
import jax.numpy as jnp
import numpy as np
from jax.experimental import pallas as pl
from jax.experimental.pallas import tpu as pltpu


_STAT_LANES = 128   # lane width of one per-tile partial-stat block
_BN_EPS = 1e-5


# ---------------------------------------------------------------------------
# Kernels.  All operate on K-major operands: w (Cout, K), patches (K, TM),
# output (Cout, TM) with the M tile on the lane axis (lane-dense stores).
# ---------------------------------------------------------------------------
def _conv_act_kernel(w_ref, p_ref, o_ref, *, act):
    """One MXU matmul (f32 accumulation) + activation, stored in o_ref.dtype."""
    y = jnp.dot(w_ref[...], p_ref[...], preferred_element_type=jnp.float32)
    if act == "lrelu":
        y = jnp.where(y > 0, y, 0.2 * y)
    elif act == "sigmoid":
        # exp runs on the EUP; the approximate reciprocal also rides the EUP
        # slot instead of a VALU divide.
        y = pl.reciprocal(1.0 + jnp.exp(-y), approx=True)
    o_ref[...] = y.astype(o_ref.dtype)


def _conv_bn_act_kernel(w_ref, p_ref, g_ref, b_ref, o_ref, *, inv_m):
    """Fully fused conv + batch stats + folded BN affine + LeakyReLU(0.2).

    Valid when the whole layer is a single M tile: zero-padded patch lanes
    contribute exactly 0 to the sums and the mean/var divide by the true pixel
    count (inv_m is a compile-time constant)."""
    y = jnp.dot(w_ref[...], p_ref[...], preferred_element_type=jnp.float32)
    s = jnp.sum(y, axis=1, keepdims=True)             # (Cout, 1)
    ss = jnp.sum(y * y, axis=1, keepdims=True)        # (Cout, 1)
    mean = s * inv_m
    var = jnp.maximum(ss * inv_m - mean * mean, 0.0)  # clamp E[y^2]-mean^2 >= 0
    scale = g_ref[...] * jax.lax.rsqrt(var + _BN_EPS)
    shift = b_ref[...] - mean * scale
    z = y * scale + shift
    o_ref[...] = jnp.where(z > 0, z, 0.2 * z).astype(o_ref.dtype)


def _conv_stats_kernel(w_ref, p_ref, y_ref, s_ref, ss_ref):
    """Multi-tile fallback, pass 1: conv tile + per-tile partial BN stats."""
    y = jnp.dot(w_ref[...], p_ref[...], preferred_element_type=jnp.float32)
    y_ref[...] = y
    s = jnp.sum(y, axis=1, keepdims=True)
    ss = jnp.sum(y * y, axis=1, keepdims=True)
    # Stat blocks are _STAT_LANES wide (lane-dense store); value is duplicated
    # across the block and lane 0 of each block is picked on the host side.
    s_ref[...] = jnp.broadcast_to(s, s_ref.shape)
    ss_ref[...] = jnp.broadcast_to(ss, ss_ref.shape)


def _bn_act_kernel(y_ref, scale_ref, shift_ref, o_ref):
    """Multi-tile fallback, pass 2: folded per-channel affine + LeakyReLU.

    Emits o_ref.dtype (bf16) directly -- the result is only ever consumed as
    the next layer's bf16 matmul input."""
    z = y_ref[...] * scale_ref[...] + shift_ref[...]
    o_ref[...] = jnp.where(z > 0, z, 0.2 * z).astype(o_ref.dtype)


# ---------------------------------------------------------------------------
# Wrapper glue
# ---------------------------------------------------------------------------
def _cdiv(a, b):
    return -(-a // b)


def _default_min_tiles():
    """v7x has 2 TensorCores; give 'parallel' grids >= 2 tiles when possible."""
    try:
        kind = jax.devices()[0].device_kind.lower()
    except Exception:
        return 1
    return 2 if ("v7" in kind or "tpu7" in kind) else 1


def _tile_lanes(m, tm_max, min_tiles):
    """Pick the lane tile TM (multiple of 128), padded M and tile count.

    Tiles are balanced so zero-padding stays below 128 lanes per tile instead
    of re-materializing the patches just to round M up to a tile multiple."""
    nt = _cdiv(m, tm_max)
    if min_tiles > 1 and m >= 1024:       # enough work to split across cores
        nt = max(nt, min_tiles)
    tm = _cdiv(_cdiv(m, nt), 128) * 128
    nt = _cdiv(m, tm)
    return tm, nt * tm, nt


def _im2col_kmajor(x_cf, kh, kw, stride, pad):
    """Channel-first (Cin, N, H, W) -> K-major patches (KH*KW*Cin, M).

    Everything stays in the input dtype (bf16), so the duplicated patch tensor
    is built/read at half width.
    TODO(synk): this still materializes a KH*KW-duplicated tensor in HBM; a
    phase-decomposed tap grid axis ("arbitrary" + f32 VMEM accumulator) would
    cut the dominant read stream ~4x for large batches."""
    cin, n, h, w = x_cf.shape
    xp = jnp.pad(x_cf, ((0, 0), (0, 0), (pad, pad), (pad, pad)))
    oh = (h + 2 * pad - kh) // stride + 1
    ow = (w + 2 * pad - kw) // stride + 1
    m = n * oh * ow
    taps = []
    for i in range(kh):
        for j in range(kw):
            sl = jax.lax.slice(
                xp,
                (0, 0, i, j),
                (cin, n, i + (oh - 1) * stride + 1, j + (ow - 1) * stride + 1),
                (1, 1, stride, stride),
            )
            taps.append(sl.reshape(cin, m))
    return jnp.concatenate(taps, axis=0), oh, ow   # (K, M), tap index slowest


def conv_block(x_cf, w, gamma=None, beta=None, *, kh, kw, stride, pad,
               use_bn, act, out_dtype, tm_max=2048, min_tiles=1):
    """One conv(+BatchNorm)+activation layer.

    x_cf: (Cin, N, H, W) activation, already in the matmul dtype (bf16).
    w:    (Cout, Cin, KH, KW) f32 (PyTorch OIHW).
    Returns (Cout, N, OH, OW) in out_dtype (channel-first, so it feeds the next
    layer's K-major im2col without any extra transpose)."""
    cin, n, _, _ = x_cf.shape
    cout = w.shape[0]
    cout_p = _cdiv(cout, 8) * 8          # sublane-friendly output row count
    k = kh * kw * cin

    patches, oh, ow = _im2col_kmajor(x_cf, kh, kw, stride, pad)
    m = n * oh * ow
    tm, m_pad, nt = _tile_lanes(m, tm_max, min_tiles)
    if m_pad != m:
        # Padding is < 128 lanes per tile (balanced tiles); zero lanes
        # contribute nothing to the conv output or the BN sums.
        patches = jnp.pad(patches, ((0, 0), (0, m_pad - m)))

    # OIHW -> (Cout, KH*KW*Cin), tap index slowest (matches the patch rows).
    w_k = jnp.transpose(w, (0, 2, 3, 1)).reshape(cout, k).astype(x_cf.dtype)
    if cout_p != cout:
        w_k = jnp.pad(w_k, ((0, cout_p - cout), (0, 0)))

    w_spec = pl.BlockSpec((cout_p, k), lambda i: (0, 0))
    p_spec = pl.BlockSpec((k, tm), lambda i: (0, i))
    y_spec = pl.BlockSpec((cout_p, tm), lambda i: (0, i))
    ch_spec = pl.BlockSpec((cout_p, 1), lambda i: (0, 0))
    cparams = pltpu.CompilerParams(dimension_semantics=("parallel",))

    if not use_bn:
        out = pl.pallas_call(
            functools.partial(_conv_act_kernel, act=act),
            grid=(nt,),
            in_specs=[w_spec, p_spec],
            out_specs=y_spec,
            out_shape=jax.ShapeDtypeStruct((cout_p, m_pad), out_dtype),
            compiler_params=cparams,
        )(w_k, patches)
    else:
        g = gamma.reshape(cout, 1).astype(jnp.float32)
        b = beta.reshape(cout, 1).astype(jnp.float32)
        if cout_p != cout:
            g = jnp.pad(g, ((0, cout_p - cout), (0, 0)))
            b = jnp.pad(b, ((0, cout_p - cout), (0, 0)))

        if nt == 1:
            # Single M tile: conv + stats + BN + LeakyReLU fully fused -- one
            # launch, no extra HBM round trip.  This is the path every BN layer
            # takes at the benchmark shapes.
            out = pl.pallas_call(
                functools.partial(_conv_bn_act_kernel, inv_m=1.0 / m),
                grid=(1,),
                in_specs=[w_spec, p_spec, ch_spec, ch_spec],
                out_specs=y_spec,
                out_shape=jax.ShapeDtypeStruct((cout_p, m_pad), out_dtype),
                compiler_params=cparams,
            )(w_k, patches, g, b)
        else:
            # Large-batch fallback: two passes (stats are cross-tile).
            stat_spec = pl.BlockSpec((cout_p, _STAT_LANES), lambda i: (0, i))
            y, psum, psq = pl.pallas_call(
                _conv_stats_kernel,
                grid=(nt,),
                in_specs=[w_spec, p_spec],
                out_specs=(y_spec, stat_spec, stat_spec),
                out_shape=(
                    jax.ShapeDtypeStruct((cout_p, m_pad), jnp.float32),
                    jax.ShapeDtypeStruct((cout_p, _STAT_LANES * nt), jnp.float32),
                    jax.ShapeDtypeStruct((cout_p, _STAT_LANES * nt), jnp.float32),
                ),
                compiler_params=cparams,
            )(w_k, patches)

            # Tiny cross-tile reduction in JAX: each stat block is the per-tile
            # value broadcast across _STAT_LANES lanes -> pick lane 0 of each.
            total = jnp.sum(psum[:, ::_STAT_LANES], axis=1, keepdims=True)
            total_sq = jnp.sum(psq[:, ::_STAT_LANES], axis=1, keepdims=True)
            mean = total / m
            var = jnp.maximum(total_sq / m - mean * mean, 0.0)
            scale = g * jax.lax.rsqrt(var + _BN_EPS)
            shift = b - mean * scale

            out = pl.pallas_call(
                _bn_act_kernel,
                grid=(nt,),
                in_specs=[y_spec, ch_spec, ch_spec],
                out_specs=y_spec,
                out_shape=jax.ShapeDtypeStruct((cout_p, m_pad), out_dtype),
                compiler_params=cparams,
            )(y, scale, shift)

    return out[:cout, :m].reshape(cout, n, oh, ow)


def init_params(key, nc, ndif):
    ks = jax.random.split(key, 5)

    def conv_w(k, cout, cin, kh, kw):
        return 0.02 * jax.random.normal(k, (cout, cin, kh, kw), jnp.float32)

    return {
        "w1": conv_w(ks[0], ndif, nc, 4, 4),
        "w2": conv_w(ks[1], ndif * 2, ndif, 4, 4),
        "w3": conv_w(ks[2], ndif * 4, ndif * 2, 4, 4),
        "w4": conv_w(ks[3], ndif * 8, ndif * 4, 4, 4),
        "w5": conv_w(ks[4], 1, ndif * 8, 3, 3),
        # BatchNorm affine params (PyTorch default init: weight=1, bias=0)
        "g2": jnp.ones((ndif * 2,), jnp.float32),
        "b2": jnp.zeros((ndif * 2,), jnp.float32),
        "g3": jnp.ones((ndif * 4,), jnp.float32),
        "b3": jnp.zeros((ndif * 4,), jnp.float32),
        "g4": jnp.ones((ndif * 8,), jnp.float32),
        "b4": jnp.zeros((ndif * 8,), jnp.float32),
    }


def discriminator_forward(params, x_nchw, *, matmul_dtype=jnp.bfloat16,
                          tm_max=2048, min_tiles=None):
    """Equivalent of Discriminator.forward; input NCHW, output (N*OH*OW, 1)."""
    if min_tiles is None:
        min_tiles = _default_min_tiles()

    # Cast to bf16 ONCE -- before any pad / im2col -- and go channel-first so
    # every layer's K-major patch build is a plain slice of the previous
    # layer's (Cout, M) output.
    x = jnp.transpose(x_nchw.astype(matmul_dtype), (1, 0, 2, 3))  # (C, N, H, W)
    blk = functools.partial(conv_block, tm_max=tm_max, min_tiles=min_tiles)

    h = blk(x, params["w1"], kh=4, kw=4, stride=2, pad=1,
            use_bn=False, act="lrelu", out_dtype=matmul_dtype)
    h = blk(h, params["w2"], params["g2"], params["b2"], kh=4, kw=4, stride=2,
            pad=1, use_bn=True, act="lrelu", out_dtype=matmul_dtype)
    h = blk(h, params["w3"], params["g3"], params["b3"], kh=4, kw=4, stride=2,
            pad=1, use_bn=True, act="lrelu", out_dtype=matmul_dtype)
    h = blk(h, params["w4"], params["g4"], params["b4"], kh=4, kw=4, stride=2,
            pad=1, use_bn=True, act="lrelu", out_dtype=matmul_dtype)
    h = blk(h, params["w5"], kh=3, kw=3, stride=1, pad=0,
            use_bn=False, act="sigmoid", out_dtype=jnp.float32)

    # TODO(synk): at these benchmark shapes the whole network fits in VMEM on
    # every TPU generation; fusing all 5 layers into one pallas_call with
    # VMEM-resident activations (in-kernel strided tap reads) would remove the
    # remaining per-layer launches and HBM round trips.
    # TODO(synk): BatchNorm running_mean/running_var buffer updates (training
    # side-effects) are not reproduced; only the forward math is.

    # h: (1, N, OH, OW) channel-first == NCHW (N, 1, OH, OW).view(-1, 1) since
    # the final channel count is 1.
    return h.reshape(-1, 1)


def reference_forward(params, x_nchw, matmul_dtype=jnp.float32):
    """Pure-JAX reference (no Pallas) used for correctness checks."""
    def conv(x, w, stride, pad):
        return jax.lax.conv_general_dilated(
            x.astype(matmul_dtype), w.astype(matmul_dtype),
            (stride, stride), [(pad, pad), (pad, pad)],
            dimension_numbers=("NCHW", "OIHW", "NCHW"),
            preferred_element_type=jnp.float32)

    def bn(x):
        mean = jnp.mean(x, axis=(0, 2, 3), keepdims=True)
        var = jnp.mean((x - mean) ** 2, axis=(0, 2, 3), keepdims=True)
        return (x - mean) * jax.lax.rsqrt(var + _BN_EPS)  # gamma=1, beta=0

    def lrelu(x):
        return jnp.where(x > 0, x, 0.2 * x)

    h = lrelu(conv(x_nchw, params["w1"], 2, 1))
    h = lrelu(bn(conv(h, params["w2"], 2, 1)))
    h = lrelu(bn(conv(h, params["w3"], 2, 1)))
    h = lrelu(bn(conv(h, params["w4"], 2, 1)))
    h = jax.nn.sigmoid(conv(h, params["w5"], 1, 0))
    return h.reshape(-1, 1)


if __name__ == "__main__":
    NC, NDIF = 3, 8
    N, H, W = 2, 48, 48  # 48 -> 24 -> 12 -> 6 -> 3 -> 1 (final 3x3 valid conv)

    key = jax.random.PRNGKey(0)
    kp, kx = jax.random.split(key)
    params = init_params(kp, NC, NDIF)
    x = jax.random.normal(kx, (N, NC, H, W), jnp.float32)  # NCHW like PyTorch

    fwd = jax.jit(discriminator_forward)
    out = jax.block_until_ready(fwd(params, x))
    assert out.shape == (N, 1), out.shape

    # Check vs a pure-JAX reference using the same bf16 matmul inputs
    # (validates the K-major kernels / tiling / fused-BN machinery; the small
    # residual comes from the approximate-EUP reciprocal in the sigmoid head
    # and f32 accumulation-order differences).
    ref_bf16 = np.asarray(reference_forward(params, x, jnp.bfloat16))
    assert np.allclose(np.asarray(out), ref_bf16, rtol=1e-2, atol=1e-2), \
        float(np.max(np.abs(np.asarray(out) - ref_bf16)))

    # Also exercise the multi-tile / two-pass BatchNorm fallback (partial-stat
    # reduction over zero-padded lanes) by forcing small lane tiles.
    fwd_small = jax.jit(functools.partial(discriminator_forward, tm_max=128))
    out_small = jax.block_until_ready(fwd_small(params, x))
    assert np.allclose(np.asarray(out_small), ref_bf16, rtol=1e-2, atol=1e-2), \
        float(np.max(np.abs(np.asarray(out_small) - ref_bf16)))

    # Looser check vs the full-f32 (PyTorch-semantics) reference: quantifies
    # the deliberate bf16-matmul precision trade-off.
    ref_f32 = np.asarray(reference_forward(params, x, jnp.float32))
    assert np.allclose(np.asarray(out), ref_f32, rtol=5e-2, atol=5e-2), \
        float(np.max(np.abs(np.asarray(out) - ref_f32)))

    print("KERNEL_OK")
</pallas_src>

<mosaic_0001>
module attributes {stable_mosaic.version = 11 : i64} {
  func.func @_conv_act_kernel(%arg0: i32, %arg1: memref<8x48xbf16, #tpu.memory_space<vmem>>, %arg2: memref<48x1152xbf16, #tpu.memory_space<vmem>>, %arg3: memref<8x1152xbf16, #tpu.memory_space<vmem>>) attributes {dimension_semantics = [#tpu.dimension_semantics<parallel>], iteration_bounds = array<i64: 1>, scalar_prefetch = 0 : i64, scratch_operands = 0 : i64, tpu.core_type = #tpu.core_type<tc>, window_params = [{pipeline_mode = #tpu.pipeline_mode<synchronous>, transform_indices = @transform_0, window_bounds = array<i64: 8, 48>}, {transform_indices = @transform_1, window_bounds = array<i64: 48, 1152>}, {transform_indices = @transform_2, window_bounds = array<i64: 8, 1152>}]} {
    %c0 = arith.constant 0 : index
    %c0_0 = arith.constant 0 : index
    %0 = vector.load %arg1[%c0, %c0_0] : memref<8x48xbf16, #tpu.memory_space<vmem>>, vector<8x48xbf16>
    %c0_1 = arith.constant 0 : index
    %c0_2 = arith.constant 0 : index
    %1 = vector.load %arg2[%c0_1, %c0_2] : memref<48x1152xbf16, #tpu.memory_space<vmem>>, vector<48x1152xbf16>
    %cst = arith.constant dense<0.000000e+00> : vector<8x1152xf32>
    %2 = tpu.matmul %0, %1, %cst {dimension_numbers = #tpu.dot_dimension_numbers<[1], [0], [0], [1], [0, 0, 1, 1], [], []>} : vector<8x48xbf16>, vector<48x1152xbf16>, vector<8x1152xf32> -> vector<8x1152xf32>
    %cst_3 = arith.constant 0.000000e+00 : f32
    %3 = vector.broadcast %cst_3 : f32 to vector<8x1152xf32>
    %4 = arith.cmpf ogt, %2, %3 : vector<8x1152xf32>
    %cst_4 = arith.constant 2.000000e-01 : f32
    %5 = vector.broadcast %cst_4 : f32 to vector<8x1152xf32>
    %6 = arith.mulf %5, %2 : vector<8x1152xf32>
    %7 = arith.select %4, %2, %6 : vector<8x1152xi1>, vector<8x1152xf32>
    %8 = arith.truncf %7 : vector<8x1152xf32> to vector<8x1152xbf16>
    %c0_5 = arith.constant 0 : index
    %c0_6 = arith.constant 0 : index
    %9 = vector.load %arg3[%c0_5, %c0_6] : memref<8x1152xbf16, #tpu.memory_space<vmem>>, vector<8x1152xbf16>
    tpu.vector_store %arg3[%c0_5, %c0_6], %8 {strides = array<i32>} : memref<8x1152xbf16, #tpu.memory_space<vmem>>, vector<8x1152xbf16>,
    return
  }
  func.func @transform_0(%arg0: i32) -> (i32, i32) {
    %c0_i32 = arith.constant 0 : i32
    %c0_i32_0 = arith.constant 0 : i32
    %c0_i32_1 = arith.constant 0 : i32
    return %c0_i32, %c0_i32_0 : i32, i32
  }
  func.func @transform_1(%arg0: i32) -> (i32, i32) {
    %c0_i32 = arith.constant 0 : i32
    %c0_i32_0 = arith.constant 0 : i32
    return %c0_i32, %arg0 : i32, i32
  }
  func.func @transform_2(%arg0: i32) -> (i32, i32) {
    %c0_i32 = arith.constant 0 : i32
    %c0_i32_0 = arith.constant 0 : i32
    return %c0_i32, %arg0 : i32, i32
  }
}

module attributes {stable_mosaic.version = 11 : i64} {
  func.func @_conv_bn_act_kernel(%arg0: i32, %arg1: memref<16x128xbf16, #tpu.memory_space<vmem>>, %arg2: memref<128x384xbf16, #tpu.memory_space<vmem>>, %arg3: memref<16x1xf32, #tpu.memory_space<vmem>>, %arg4: memref<16x1xf32, #tpu.memory_space<vmem>>, %arg5: memref<16x384xbf16, #tpu.memory_space<vmem>>) attributes {dimension_semantics = [#tpu.dimension_semantics<parallel>], iteration_bounds = array<i64: 1>, scalar_prefetch = 0 : i64, scratch_operands = 0 : i64, tpu.core_type = #tpu.core_type<tc>, window_params = [{pipeline_mode = #tpu.pipeline_mode<synchronous>, transform_indices = @transform_0, window_bounds = array<i64: 16, 128>}, {transform_indices = @transform_1, window_bounds = array<i64: 128, 384>}, {pipeline_mode = #tpu.pipeline_mode<synchronous>, transform_indices = @transform_2, window_bounds = array<i64: 16, 1>}, {pipeline_mode = #tpu.pipeline_mode<synchronous>, transform_indices = @transform_3, window_bounds = array<i64: 16, 1>}, {transform_indices = @transform_4, window_bounds = array<i64: 16, 384>}]} {
    %c0 = arith.constant 0 : index
    %c0_0 = arith.constant 0 : index
    %0 = vector.load %arg1[%c0, %c0_0] : memref<16x128xbf16, #tpu.memory_space<vmem>>, vector<16x128xbf16>
    %c0_1 = arith.constant 0 : index
    %c0_2 = arith.constant 0 : index
    %1 = vector.load %arg2[%c0_1, %c0_2] : memref<128x384xbf16, #tpu.memory_space<vmem>>, vector<128x384xbf16>
    %cst = arith.constant dense<0.000000e+00> : vector<16x384xf32>
    %2 = tpu.matmul %0, %1, %cst {dimension_numbers = #tpu.dot_dimension_numbers<[1], [0], [0], [1], [0, 0, 1, 1], [], []>} : vector<16x128xbf16>, vector<128x384xbf16>, vector<16x384xf32> -> vector<16x384xf32>
    %cst_3 = arith.constant dense<0.000000e+00> : vector<16xf32>
    %3 = vector.multi_reduction <add>, %2, %cst_3 [1] : vector<16x384xf32> to vector<16xf32>
    %4 = vector.shape_cast %3 : vector<16xf32> to vector<16x1xf32>
    %5 = arith.mulf %2, %2 : vector<16x384xf32>
    %cst_4 = arith.constant dense<0.000000e+00> : vector<16xf32>
    %6 = vector.multi_reduction <add>, %5, %cst_4 [1] : vector<16x384xf32> to vector<16xf32>
    %7 = vector.shape_cast %6 : vector<16xf32> to vector<16x1xf32>
    %cst_5 = arith.constant 0.00347222225 : f32
    %8 = vector.broadcast %cst_5 : f32 to vector<16x1xf32>
    %9 = arith.mulf %4, %8 : vector<16x1xf32>
    %cst_6 = arith.constant 0.00347222225 : f32
    %10 = vector.broadcast %cst_6 : f32 to vector<16x1xf32>
    %11 = arith.mulf %7, %10 : vector<16x1xf32>
    %12 = arith.mulf %9, %9 : vector<16x1xf32>
    %13 = arith.subf %11, %12 : vector<16x1xf32>
    %cst_7 = arith.constant 0.000000e+00 : f32
    %14 = vector.broadcast %cst_7 : f32 to vector<16x1xf32>
    %15 = arith.maximumf %13, %14 : vector<16x1xf32>
    %c0_8 = arith.constant 0 : index
    %c0_9 = arith.constant 0 : index
    %16 = vector.load %arg3[%c0_8, %c0_9] : memref<16x1xf32, #tpu.memory_space<vmem>>, vector<16x1xf32>
    %cst_10 = arith.constant 9.99999974E-6 : f32
    %17 = vector.broadcast %cst_10 : f32 to vector<16x1xf32>
    %18 = arith.addf %15, %17 : vector<16x1xf32>
    %19 = math.rsqrt %18 : vector<16x1xf32>
    %20 = arith.mulf %16, %19 : vector<16x1xf32>
    %c0_11 = arith.constant 0 : index
    %c0_12 = arith.constant 0 : index
    %21 = vector.load %arg4[%c0_11, %c0_12] : memref<16x1xf32, #tpu.memory_space<vmem>>, vector<16x1xf32>
    %22 = arith.mulf %9, %20 : vector<16x1xf32>
    %23 = arith.subf %21, %22 : vector<16x1xf32>
    %24 = vector.broadcast %20 : vector<16x1xf32> to vector<16x384xf32>
    %25 = arith.mulf %2, %24 : vector<16x384xf32>
    %26 = vector.broadcast %23 : vector<16x1xf32> to vector<16x384xf32>
    %27 = arith.addf %25, %26 : vector<16x384xf32>
    %cst_13 = arith.constant 0.000000e+00 : f32
    %28 = vector.broadcast %cst_13 : f32 to vector<16x384xf32>
    %29 = arith.cmpf ogt, %27, %28 : vector<16x384xf32>
    %cst_14 = arith.constant 2.000000e-01 : f32
    %30 = vector.broadcast %cst_14 : f32 to vector<16x384xf32>
    %31 = arith.mulf %30, %27 : vector<16x384xf32>
    %32 = arith.select %29, %27, %31 : vector<16x384xi1>, vector<16x384xf32>
    %33 = arith.truncf %32 : vector<16x384xf32> to vector<16x384xbf16>
    %c0_15 = arith.constant 0 : index
    %c0_16 = arith.constant 0 : index
    %34 = vector.load %arg5[%c0_15, %c0_16] : memref<16x384xbf16, #tpu.memory_space<vmem>>, vector<16x384xbf16>
    tpu.vector_store %arg5[%c0_15, %c0_16], %33 {strides = array<i32>} : memref<16x384xbf16, #tpu.memory_space<vmem>>, vector<16x384xbf16>,
    return
  }
  func.func @transform_0(%arg0: i32) -> (i32, i32) {
    %c0_i32 = arith.constant 0 : i32
    %c0_i32_0 = arith.constant 0 : i32
    %c0_i32_1 = arith.constant 0 : i32
    return %c0_i32, %c0_i32_0 : i32, i32
  }
  func.func @transform_1(%arg0: i32) -> (i32, i32) {
    %c0_i32 = arith.constant 0 : i32
    %c0_i32_0 = arith.constant 0 : i32
    return %c0_i32, %arg0 : i32, i32
  }
  func.func @transform_2(%arg0: i32) -> (i32, i32) {
    %c0_i32 = arith.constant 0 : i32
    %c0_i32_0 = arith.constant 0 : i32
    %c0_i32_1 = arith.constant 0 : i32
    return %c0_i32, %c0_i32_0 : i32, i32
  }
  func.func @transform_3(%arg0: i32) -> (i32, i32) {
    %c0_i32 = arith.constant 0 : i32
    %c0_i32_0 = arith.constant 0 : i32
    %c0_i32_1 = arith.constant 0 : i32
    return %c0_i32, %c0_i32_0 : i32, i32
  }
  func.func @transform_4(%arg0: i32) -> (i32, i32) {
    %c0_i32 = arith.constant 0 : i32
    %c0_i32_0 = arith.constant 0 : i32
    return %c0_i32, %arg0 : i32, i32
  }
}

module attributes {stable_mosaic.version = 11 : i64} {
  func.func @_conv_bn_act_kernel(%arg0: i32, %arg1: memref<32x256xbf16, #tpu.memory_space<vmem>>, %arg2: memref<256x128xbf16, #tpu.memory_space<vmem>>, %arg3: memref<32x1xf32, #tpu.memory_space<vmem>>, %arg4: memref<32x1xf32, #tpu.memory_space<vmem>>, %arg5: memref<32x128xbf16, #tpu.memory_space<vmem>>) attributes {dimension_semantics = [#tpu.dimension_semantics<parallel>], iteration_bounds = array<i64: 1>, scalar_prefetch = 0 : i64, scratch_operands = 0 : i64, tpu.core_type = #tpu.core_type<tc>, window_params = [{pipeline_mode = #tpu.pipeline_mode<synchronous>, transform_indices = @transform_0, window_bounds = array<i64: 32, 256>}, {transform_indices = @transform_1, window_bounds = array<i64: 256, 128>}, {pipeline_mode = #tpu.pipeline_mode<synchronous>, transform_indices = @transform_2, window_bounds = array<i64: 32, 1>}, {pipeline_mode = #tpu.pipeline_mode<synchronous>, transform_indices = @transform_3, window_bounds = array<i64: 32, 1>}, {transform_indices = @transform_4, window_bounds = array<i64: 32, 128>}]} {
    %c0 = arith.constant 0 : index
    %c0_0 = arith.constant 0 : index
    %0 = vector.load %arg1[%c0, %c0_0] : memref<32x256xbf16, #tpu.memory_space<vmem>>, vector<32x256xbf16>
    %c0_1 = arith.constant 0 : index
    %c0_2 = arith.constant 0 : index
    %1 = vector.load %arg2[%c0_1, %c0_2] : memref<256x128xbf16, #tpu.memory_space<vmem>>, vector<256x128xbf16>
    %cst = arith.constant dense<0.000000e+00> : vector<32x128xf32>
    %2 = tpu.matmul %0, %1, %cst {dimension_numbers = #tpu.dot_dimension_numbers<[1], [0], [0], [1], [0, 0, 1, 1], [], []>} : vector<32x256xbf16>, vector<256x128xbf16>, vector<32x128xf32> -> vector<32x128xf32>
    %cst_3 = arith.constant dense<0.000000e+00> : vector<32xf32>
    %3 = vector.multi_reduction <add>, %2, %cst_3 [1] : vector<32x128xf32> to vector<32xf32>
    %4 = vector.shape_cast %3 : vector<32xf32> to vector<32x1xf32>
    %5 = arith.mulf %2, %2 : vector<32x128xf32>
    %cst_4 = arith.constant dense<0.000000e+00> : vector<32xf32>
    %6 = vector.multi_reduction <add>, %5, %cst_4 [1] : vector<32x128xf32> to vector<32xf32>
    %7 = vector.shape_cast %6 : vector<32xf32> to vector<32x1xf32>
    %cst_5 = arith.constant 0.013888889 : f32
    %8 = vector.broadcast %cst_5 : f32 to vector<32x1xf32>
    %9 = arith.mulf %4, %8 : vector<32x1xf32>
    %cst_6 = arith.constant 0.013888889 : f32
    %10 = vector.broadcast %cst_6 : f32 to vector<32x1xf32>
    %11 = arith.mulf %7, %10 : vector<32x1xf32>
    %12 = arith.mulf %9, %9 : vector<32x1xf32>
    %13 = arith.subf %11, %12 : vector<32x1xf32>
    %cst_7 = arith.constant 0.000000e+00 : f32
    %14 = vector.broadcast %cst_7 : f32 to vector<32x1xf32>
    %15 = arith.maximumf %13, %14 : vector<32x1xf32>
    %c0_8 = arith.constant 0 : index
    %c0_9 = arith.constant 0 : index
    %16 = vector.load %arg3[%c0_8, %c0_9] : memref<32x1xf32, #tpu.memory_space<vmem>>, vector<32x1xf32>
    %cst_10 = arith.constant 9.99999974E-6 : f32
    %17 = vector.broadcast %cst_10 : f32 to vector<32x1xf32>
    %18 = arith.addf %15, %17 : vector<32x1xf32>
    %19 = math.rsqrt %18 : vector<32x1xf32>
    %20 = arith.mulf %16, %19 : vector<32x1xf32>
    %c0_11 = arith.constant 0 : index
    %c0_12 = arith.constant 0 : index
    %21 = vector.load %arg4[%c0_11, %c0_12] : memref<32x1xf32, #tpu.memory_space<vmem>>, vector<32x1xf32>
    %22 = arith.mulf %9, %20 : vector<32x1xf32>
    %23 = arith.subf %21, %22 : vector<32x1xf32>
    %24 = vector.broadcast %20 : vector<32x1xf32> to vector<32x128xf32>
    %25 = arith.mulf %2, %24 : vector<32x128xf32>
    %26 = vector.broadcast %23 : vector<32x1xf32> to vector<32x128xf32>
    %27 = arith.addf %25, %26 : vector<32x128xf32>
    %cst_13 = arith.constant 0.000000e+00 : f32
    %28 = vector.broadcast %cst_13 : f32 to vector<32x128xf32>
    %29 = arith.cmpf ogt, %27, %28 : vector<32x128xf32>
    %cst_14 = arith.constant 2.000000e-01 : f32
    %30 = vector.broadcast %cst_14 : f32 to vector<32x128xf32>
    %31 = arith.mulf %30, %27 : vector<32x128xf32>
    %32 = arith.select %29, %27, %31 : vector<32x128xi1>, vector<32x128xf32>
    %33 = arith.truncf %32 : vector<32x128xf32> to vector<32x128xbf16>
    %c0_15 = arith.constant 0 : index
    %c0_16 = arith.constant 0 : index
    %34 = vector.load %arg5[%c0_15, %c0_16] : memref<32x128xbf16, #tpu.memory_space<vmem>>, vector<32x128xbf16>
    tpu.vector_store %arg5[%c0_15, %c0_16], %33 {strides = array<i32>} : memref<32x128xbf16, #tpu.memory_space<vmem>>, vector<32x128xbf16>,
    return
  }
  func.func @transform_0(%arg0: i32) -> (i32, i32) {
    %c0_i32 = arith.constant 0 : i32
    %c0_i32_0 = arith.constant 0 : i32
    %c0_i32_1 = arith.constant 0 : i32
    return %c0_i32, %c0_i32_0 : i32, i32
  }
  func.func @transform_1(%arg0: i32) -> (i32, i32) {
    %c0_i32 = arith.constant 0 : i32
    %c0_i32_0 = arith.constant 0 : i32
    return %c0_i32, %arg0 : i32, i32
  }
  func.func @transform_2(%arg0: i32) -> (i32, i32) {
    %c0_i32 = arith.constant 0 : i32
    %c0_i32_0 = arith.constant 0 : i32
    %c0_i32_1 = arith.constant 0 : i32
    return %c0_i32, %c0_i32_0 : i32, i32
  }
  func.func @transform_3(%arg0: i32) -> (i32, i32) {
    %c0_i32 = arith.constant 0 : i32
    %c0_i32_0 = arith.constant 0 : i32
    %c0_i32_1 = arith.constant 0 : i32
    return %c0_i32, %c0_i32_0 : i32, i32
  }
  func.func @transform_4(%arg0: i32) -> (i32, i32) {
    %c0_i32 = arith.constant 0 : i32
    %c0_i32_0 = arith.constant 0 : i32
    return %c0_i32, %arg0 : i32, i32
  }
}

module attributes {stable_mosaic.version = 11 : i64} {
  func.func @_conv_bn_act_kernel(%arg0: i32, %arg1: memref<64x512xbf16, #tpu.memory_space<vmem>>, %arg2: memref<512x128xbf16, #tpu.memory_space<vmem>>, %arg3: memref<64x1xf32, #tpu.memory_space<vmem>>, %arg4: memref<64x1xf32, #tpu.memory_space<vmem>>, %arg5: memref<64x128xbf16, #tpu.memory_space<vmem>>) attributes {dimension_semantics = [#tpu.dimension_semantics<parallel>], iteration_bounds = array<i64: 1>, scalar_prefetch = 0 : i64, scratch_operands = 0 : i64, tpu.core_type = #tpu.core_type<tc>, window_params = [{pipeline_mode = #tpu.pipeline_mode<synchronous>, transform_indices = @transform_0, window_bounds = array<i64: 64, 512>}, {transform_indices = @transform_1, window_bounds = array<i64: 512, 128>}, {pipeline_mode = #tpu.pipeline_mode<synchronous>, transform_indices = @transform_2, window_bounds = array<i64: 64, 1>}, {pipeline_mode = #tpu.pipeline_mode<synchronous>, transform_indices = @transform_3, window_bounds = array<i64: 64, 1>}, {transform_indices = @transform_4, window_bounds = array<i64: 64, 128>}]} {
    %c0 = arith.constant 0 : index
    %c0_0 = arith.constant 0 : index
    %0 = vector.load %arg1[%c0, %c0_0] : memref<64x512xbf16, #tpu.memory_space<vmem>>, vector<64x512xbf16>
    %c0_1 = arith.constant 0 : index
    %c0_2 = arith.constant 0 : index
    %1 = vector.load %arg2[%c0_1, %c0_2] : memref<512x128xbf16, #tpu.memory_space<vmem>>, vector<512x128xbf16>
    %cst = arith.constant dense<0.000000e+00> : vector<64x128xf32>
    %2 = tpu.matmul %0, %1, %cst {dimension_numbers = #tpu.dot_dimension_numbers<[1], [0], [0], [1], [0, 0, 1, 1], [], []>} : vector<64x512xbf16>, vector<512x128xbf16>, vector<64x128xf32> -> vector<64x128xf32>
    %cst_3 = arith.constant dense<0.000000e+00> : vector<64xf32>
    %3 = vector.multi_reduction <add>, %2, %cst_3 [1] : vector<64x128xf32> to vector<64xf32>
    %4 = vector.shape_cast %3 : vector<64xf32> to vector<64x1xf32>
    %5 = arith.mulf %2, %2 : vector<64x128xf32>
    %cst_4 = arith.constant dense<0.000000e+00> : vector<64xf32>
    %6 = vector.multi_reduction <add>, %5, %cst_4 [1] : vector<64x128xf32> to vector<64xf32>
    %7 = vector.shape_cast %6 : vector<64xf32> to vector<64x1xf32>
    %cst_5 = arith.constant 0.055555556 : f32
    %8 = vector.broadcast %cst_5 : f32 to vector<64x1xf32>
    %9 = arith.mulf %4, %8 : vector<64x1xf32>
    %cst_6 = arith.constant 0.055555556 : f32
    %10 = vector.broadcast %cst_6 : f32 to vector<64x1xf32>
    %11 = arith.mulf %7, %10 : vector<64x1xf32>
    %12 = arith.mulf %9, %9 : vector<64x1xf32>
    %13 = arith.subf %11, %12 : vector<64x1xf32>
    %cst_7 = arith.constant 0.000000e+00 : f32
    %14 = vector.broadcast %cst_7 : f32 to vector<64x1xf32>
    %15 = arith.maximumf %13, %14 : vector<64x1xf32>
    %c0_8 = arith.constant 0 : index
    %c0_9 = arith.constant 0 : index
    %16 = vector.load %arg3[%c0_8, %c0_9] : memref<64x1xf32, #tpu.memory_space<vmem>>, vector<64x1xf32>
    %cst_10 = arith.constant 9.99999974E-6 : f32
    %17 = vector.broadcast %cst_10 : f32 to vector<64x1xf32>
    %18 = arith.addf %15, %17 : vector<64x1xf32>
    %19 = math.rsqrt %18 : vector<64x1xf32>
    %20 = arith.mulf %16, %19 : vector<64x1xf32>
    %c0_11 = arith.constant 0 : index
    %c0_12 = arith.constant 0 : index
    %21 = vector.load %arg4[%c0_11, %c0_12] : memref<64x1xf32, #tpu.memory_space<vmem>>, vector<64x1xf32>
    %22 = arith.mulf %9, %20 : vector<64x1xf32>
    %23 = arith.subf %21, %22 : vector<64x1xf32>
    %24 = vector.broadcast %20 : vector<64x1xf32> to vector<64x128xf32>
    %25 = arith.mulf %2, %24 : vector<64x128xf32>
    %26 = vector.broadcast %23 : vector<64x1xf32> to vector<64x128xf32>
    %27 = arith.addf %25, %26 : vector<64x128xf32>
    %cst_13 = arith.constant 0.000000e+00 : f32
    %28 = vector.broadcast %cst_13 : f32 to vector<64x128xf32>
    %29 = arith.cmpf ogt, %27, %28 : vector<64x128xf32>
    %cst_14 = arith.constant 2.000000e-01 : f32
    %30 = vector.broadcast %cst_14 : f32 to vector<64x128xf32>
    %31 = arith.mulf %30, %27 : vector<64x128xf32>
    %32 = arith.select %29, %27, %31 : vector<64x128xi1>, vector<64x128xf32>
    %33 = arith.truncf %32 : vector<64x128xf32> to vector<64x128xbf16>
    %c0_15 = arith.constant 0 : index
    %c0_16 = arith.constant 0 : index
    %34 = vector.load %arg5[%c0_15, %c0_16] : memref<64x128xbf16, #tpu.memory_space<vmem>>, vector<64x128xbf16>
    tpu.vector_store %arg5[%c0_15, %c0_16], %33 {strides = array<i32>} : memref<64x128xbf16, #tpu.memory_space<vmem>>, vector<64x128xbf16>,
    return
  }
  func.func @transform_0(%arg0: i32) -> (i32, i32) {
    %c0_i32 = arith.constant 0 : i32
    %c0_i32_0 = arith.constant 0 : i32
    %c0_i32_1 = arith.constant 0 : i32
    return %c0_i32, %c0_i32_0 : i32, i32
  }
  func.func @transform_1(%arg0: i32) -> (i32, i32) {
    %c0_i32 = arith.constant 0 : i32
    %c0_i32_0 = arith.constant 0 : i32
    return %c0_i32, %arg0 : i32, i32
  }
  func.func @transform_2(%arg0: i32) -> (i32, i32) {
    %c0_i32 = arith.constant 0 : i32
    %c0_i32_0 = arith.constant 0 : i32
    %c0_i32_1 = arith.constant 0 : i32
    return %c0_i32, %c0_i32_0 : i32, i32
  }
  func.func @transform_3(%arg0: i32) -> (i32, i32) {
    %c0_i32 = arith.constant 0 : i32
    %c0_i32_0 = arith.constant 0 : i32
    %c0_i32_1 = arith.constant 0 : i32
    return %c0_i32, %c0_i32_0 : i32, i32
  }
  func.func @transform_4(%arg0: i32) -> (i32, i32) {
    %c0_i32 = arith.constant 0 : i32
    %c0_i32_0 = arith.constant 0 : i32
    return %c0_i32, %arg0 : i32, i32
  }
}

module attributes {stable_mosaic.version = 11 : i64} {
  func.func @_conv_act_kernel(%arg0: i32, %arg1: memref<8x576xbf16, #tpu.memory_space<vmem>>, %arg2: memref<576x128xbf16, #tpu.memory_space<vmem>>, %arg3: memref<8x128xf32, #tpu.memory_space<vmem>>) attributes {dimension_semantics = [#tpu.dimension_semantics<parallel>], iteration_bounds = array<i64: 1>, scalar_prefetch = 0 : i64, scratch_operands = 0 : i64, tpu.core_type = #tpu.core_type<tc>, window_params = [{pipeline_mode = #tpu.pipeline_mode<synchronous>, transform_indices = @transform_0, window_bounds = array<i64: 8, 576>}, {transform_indices = @transform_1, window_bounds = array<i64: 576, 128>}, {transform_indices = @transform_2, window_bounds = array<i64: 8, 128>}]} {
    %c0 = arith.constant 0 : index
    %c0_0 = arith.constant 0 : index
    %0 = vector.load %arg1[%c0, %c0_0] : memref<8x576xbf16, #tpu.memory_space<vmem>>, vector<8x576xbf16>
    %c0_1 = arith.constant 0 : index
    %c0_2 = arith.constant 0 : index
    %1 = vector.load %arg2[%c0_1, %c0_2] : memref<576x128xbf16, #tpu.memory_space<vmem>>, vector<576x128xbf16>
    %cst = arith.constant dense<0.000000e+00> : vector<8x128xf32>
    %2 = tpu.matmul %0, %1, %cst {dimension_numbers = #tpu.dot_dimension_numbers<[1], [0], [0], [1], [0, 0, 1, 1], [], []>} : vector<8x576xbf16>, vector<576x128xbf16>, vector<8x128xf32> -> vector<8x128xf32>
    %cst_3 = arith.constant 0.000000e+00 : f32
    %3 = vector.broadcast %cst_3 : f32 to vector<8x128xf32>
    %4 = arith.subf %3, %2 : vector<8x128xf32>
    %5 = math.exp %4 : vector<8x128xf32>
    %cst_4 = arith.constant 1.000000e+00 : f32
    %6 = vector.broadcast %cst_4 : f32 to vector<8x128xf32>
    %7 = arith.addf %6, %5 : vector<8x128xf32>
    %8 = tpu.reciprocal %7 {approx = true} : vector<8x128xf32> -> vector<8x128xf32>
    %c0_5 = arith.constant 0 : index
    %c0_6 = arith.constant 0 : index
    %9 = vector.load %arg3[%c0_5, %c0_6] : memref<8x128xf32, #tpu.memory_space<vmem>>, vector<8x128xf32>
    tpu.vector_store %arg3[%c0_5, %c0_6], %8 {strides = array<i32>} : memref<8x128xf32, #tpu.memory_space<vmem>>, vector<8x128xf32>,
    return
  }
  func.func @transform_0(%arg0: i32) -> (i32, i32) {
    %c0_i32 = arith.constant 0 : i32
    %c0_i32_0 = arith.constant 0 : i32
    %c0_i32_1 = arith.constant 0 : i32
    return %c0_i32, %c0_i32_0 : i32, i32
  }
  func.func @transform_1(%arg0: i32) -> (i32, i32) {
    %c0_i32 = arith.constant 0 : i32
    %c0_i32_0 = arith.constant 0 : i32
    return %c0_i32, %arg0 : i32, i32
  }
  func.func @transform_2(%arg0: i32) -> (i32, i32) {
    %c0_i32 = arith.constant 0 : i32
    %c0_i32_0 = arith.constant 0 : i32
    return %c0_i32, %arg0 : i32, i32
  }
}

</mosaic_0001>

<bundles_post_ra>
// kernel: discriminator_forward.5
= control target key start
LH: loop header
LB: loop body
LE: loop exit
PB: predicated region body
PF: predicated region fallthrough
CT: control target
= control target key end

     0   :  { %vm181_vm0 = vcmask 392192   ;;  %s702_s1 = inlined_call_operand.vmem [shape: bf16[48,1152], index: 1, kind: input, shape index: {}]   ;;  %s703_s0 = inlined_call_operand.vmem [shape: bf16[8,48], index: 0, kind: input, shape index: {}]   ;;  %s704_s2 = inlined_call_operand.vmem [shape: bf16[8,1152], index: 2, kind: output, shape index: {}]  }
   0x1   :  { %v417_v0 = vld [vmem:[%s702_s1 + $0x90] sm:$0xf]  ;;  %v482_v1 = vld [vmem:[%s702_s1 + $0xb0] sm:$0xf0]  ;;  %v419_v4 = vld [vmem:[%s702_s1 + $0xb4] sm:$0xf0] }
   0x2   :  { %v478_v2 = vld [vmem:[%s702_s1 + $0x94] sm:$0xf]  ;;  %v418_v3 = vor.u32 %v482_v1, %v417_v0  ;;  %v425_v5 = vld [vmem:[%s702_s1 + $0x98] sm:$0xf]  ;;  %v483_v6 = vld [vmem:[%s702_s1 + $0xb8] sm:$0xf0] }
   0x3   :  { %v422_v7 = vor.u32 %v478_v2, %v419_v4  ;;  %v426_v8 = vor.u32 %v483_v6, %v425_v5  ;;  %v479_v9 = vld [vmem:[%s702_s1 + $0x9c] sm:$0xf]  ;;  %v427_v10 = vld [vmem:[%s702_s1 + $0xbc] sm:$0xf0]  ;;  %v381_v11 = vld [vmem:[%s702_s1 + $0x48] sm:$0xf] }
   0x4   :  { %190 = vmatpush.bf16.msra.mxu0 %v418_v3  ;;  %v430_v12 = vor.u32 %v479_v9, %v427_v10  ;;  %v473_v13 = vld [vmem:[%s702_s1 + $0x68] sm:$0xf0]  ;;  %v383_v15 = vld [vmem:[%s702_s1 + $0x6c] sm:$0xf0]  ;;  %v474_v19 = vld [vmem:[%s702_s1 + $0x70] sm:$0xf0] }
   0x5   :  { %v469_v14 = vld [vmem:[%s702_s1 + $0x4c] sm:$0xf]  ;;  %203 = vmatpush.bf16.msra.mxu1 %v422_v7  ;;  %216 = vmatpush.bf16.msra.mxu2 %v426_v8  ;;  %v382_v16 = vor.u32 %v473_v13, %v381_v11  ;;  %v389_v18 = vld [vmem:[%s702_s1 + $0x50] sm:$0xf]  ;;  %v470_v20 = vld [vmem:[%s702_s1 + $0x54] sm:$0xf] }
   0x6   :  { %v386_v17 = vor.u32 %v469_v14, %v383_v15  ;;  %229 = vmatpush.bf16.msra.mxu3 %v430_v12  ;;  %v390_v21 = vor.u32 %v474_v19, %v389_v18  ;;  %v391_v22 = vld [vmem:[%s702_s1 + $0x74] sm:$0xf0]  ;;  %v345_v23 = vld [vmem:[%s702_s1] sm:$0xf]  ;;  %v464_v24 = vld [vmem:[%s702_s1 + $0x20] sm:$0xf0] }
   0x7   :  { %v394_v25 = vor.u32 %v470_v20, %v391_v22  ;;  %v460_v26 = vld [vmem:[%s702_s1 + $0x4] sm:$0xf]  ;;  %v347_v27 = vld [vmem:[%s702_s1 + $0x24] sm:$0xf0]  ;;  %v346_v29 = vor.u32 %v464_v24, %v345_v23  ;;  %v465_v30 = vld [vmem:[%s702_s1 + $0x28] sm:$0xf0] }
   0x8   :  { %v353_v28 = vld [vmem:[%s702_s1 + $0x8] sm:$0xf]  ;;  %191 = vmatpush.bf16.msra.mxu0 %v382_v16  ;;  %v461_v31 = vld [vmem:[%s702_s1 + $0xc] sm:$0xf]  ;;  %v355_v32 = vld [vmem:[%s702_s1 + $0x2c] sm:$0xf0]  ;;  %v350_v33 = vor.u32 %v460_v26, %v347_v27 }
   0x9   :  { %204 = vmatpush.bf16.msra.mxu1 %v386_v17  ;;  %217 = vmatpush.bf16.msra.mxu2 %v390_v21  ;;  %v354_v34 = vor.u32 %v465_v30, %v353_v28  ;;  %v433_v35 = vld [vmem:[%s702_s1 + $0xa0] sm:$0xf]  ;;  %v484_v36 = vld [vmem:[%s702_s1 + $0xc0] sm:$0xf0]  ;;  %v358_v37 = vor.u32 %v461_v31, %v355_v32  ;;  %v435_v41 = vld [vmem:[%s702_s1 + $0xc4] sm:$0xf0] }
   0xa   :  { %230 = vmatpush.bf16.msra.mxu3 %v394_v25  ;;  %v583_v38 = vld [vmem:[%s703_s0] sm:$0xf]  ;;  %v434_v39 = vor.u32 %v484_v36, %v433_v35  ;;  %v480_v40 = vld [vmem:[%s702_s1 + $0xa4] sm:$0xf]  ;;  %v397_v42 = vld [vmem:[%s702_s1 + $0x58] sm:$0xf] }
   0xb   :  { %v438_v43 = vor.u32 %v480_v40, %v435_v41  ;;  %v475_v44 = vld [vmem:[%s702_s1 + $0x78] sm:$0xf0]  ;;  %v441_v45 = vld [vmem:[%s702_s1 + $0xa8] sm:$0xf]  ;;  %v485_v46 = vld [vmem:[%s702_s1 + $0xc8] sm:$0xf0] }
   0xc   :  { %192 = vmatpush.bf16.msra.mxu0 %v346_v29  ;;  %v481_v47 = vld [vmem:[%s702_s1 + $0xac] sm:$0xf]  ;;  %v443_v48 = vld [vmem:[%s702_s1 + $0xcc] sm:$0xf0]  ;;  %v471_v49 = vld [vmem:[%s702_s1 + $0x5c] sm:$0xf]  ;;  %v442_v50 = vor.u32 %v485_v46, %v441_v45  ;;  %v398_v52 = vor.u32 %v475_v44, %v397_v42 }
   0xd   :  { %205 = vmatpush.bf16.msra.mxu1 %v350_v33  ;;  %218 = vmatpush.bf16.msra.mxu2 %v354_v34  ;;  %v399_v51 = vld [vmem:[%s702_s1 + $0x7c] sm:$0xf0]  ;;  %v446_v53 = vor.u32 %v481_v47, %v443_v48  ;;  %v361_v54 = vld [vmem:[%s702_s1 + $0x10] sm:$0xf]  ;;  %v476_v56 = vld [vmem:[%s702_s1 + $0x80] sm:$0xf0] }
   0xe   :  { %231 = vmatpush.bf16.msra.mxu3 %v358_v37  ;;  %v405_v55 = vld [vmem:[%s702_s1 + $0x60] sm:$0xf]  ;;  %v402_v57 = vor.u32 %v471_v49, %v399_v51  ;;  %v466_v58 = vld [vmem:[%s702_s1 + $0x30] sm:$0xf0]  ;;  %v472_v59 = vld [vmem:[%s702_s1 + $0x64] sm:$0xf] }
   0xf   :  { %451 = vmatmul.msk.bf16.vlgmr.msra.gmra.mxu0 %vm181_vm0, %v583_v38  ;;  %v407_v60 = vld [vmem:[%s702_s1 + $0x84] sm:$0xf0]  ;;  %v462_v61 = vld [vmem:[%s702_s1 + $0x14] sm:$0xf]  ;;  %v363_v62 = vld [vmem:[%s702_s1 + $0x34] sm:$0xf0]  ;;  %v406_v63 = vor.u32 %v476_v56, %v405_v55  ;;  %v362_v2 = vor.u32 %v466_v58, %v361_v54 }
  0x10   :  { %242 = vmatpush.bf16.msrb.mxu0 %v434_v39  ;;  %452 = vmatmul.msk.bf16.vlgmr.msra.gmra.mxu1 %vm181_vm0, %v583_v38  ;;  %v449_v0 = vld [vmem:[%s702_s1 + $0xb0] sm:$0xf]  ;;  %v486_v1 = vld [vmem:[%s702_s1 + $0xd0] sm:$0xf0]  ;;  %v410_v3 = vor.u32 %v472_v59, %v407_v60  ;;  %v369_v4 = vld [vmem:[%s702_s1 + $0x18] sm:$0xf]  ;;  %v366_v6 = vor.u32 %v462_v61, %v363_v62 }
  0x11   :  { %255 = vmatpush.bf16.msrb.mxu1 %v438_v43  ;;  %453 = vmatmul.msk.bf16.vlgmr.msra.gmra.mxu2 %vm181_vm0, %v583_v38  ;;  %v467_v5 = vld [vmem:[%s702_s1 + $0x38] sm:$0xf0]  ;;  %v371_v8 = vld [vmem:[%s702_s1 + $0x3c] sm:$0xf0]  ;;  %v450_v9 = vor.u32 %v486_v1, %v449_v0  ;;  %v413_v10 = vld [vmem:[%s702_s1 + $0x68] sm:$0xf] }
  0x12   :  { %454 = vmatmul.msk.bf16.vlgmr.msra.gmra.mxu3 %vm181_vm0, %v583_v38  ;;  %268 = vmatpush.bf16.msrb.mxu2 %v442_v50  ;;  %v463_v7 = vld [vmem:[%s702_s1 + $0x1c] sm:$0xf]  ;;  %v477_v11 = vld [vmem:[%s702_s1 + $0x88] sm:$0xf0]  ;;  %v370_v12 = vor.u32 %v467_v5, %v369_v4  ;;  %v377_v15 = vld [vmem:[%s702_s1 + $0x20] sm:$0xf] }
  0x13   :  { %281 = vmatpush.bf16.msrb.mxu3 %v446_v53  ;;  %v374_v13 = vor.u32 %v463_v7, %v371_v8  ;;  %v414_v14 = vor.u32 %v477_v11, %v413_v10  ;;  %v468_v16 = vld [vmem:[%s702_s1 + $0x40] sm:$0xf0] }
  0x14   :  { %243 = vmatpush.bf16.msrb.mxu0 %v398_v52  ;;  %v378_v17 = vor.u32 %v468_v16, %v377_v15 }
  0x15   :  { %256 = vmatpush.bf16.msrb.mxu1 %v402_v57 }
  0x16   :  { %269 = vmatpush.bf16.msrb.mxu2 %v406_v63 }
  0x17   :  { %282 = vmatpush.bf16.msrb.mxu3 %v410_v3 }
  0x18   :  { %244 = vmatpush.bf16.msrb.mxu0 %v362_v2 }
  0x19   :  { %257 = vmatpush.bf16.msrb.mxu1 %v366_v6 }
  0x1a   :  { %270 = vmatpush.bf16.msrb.mxu2 %v370_v12 }
  0x1b   :  { %283 = vmatpush.bf16.msrb.mxu3 %v374_v13 }
  0x1c   :  { %294 = vmatpush.bf16.msra.mxu0 %v450_v9 }
  0x1f   :  { %455 = vmatmul.msk.bf16.vlgmr.msrb.gmra.mxu0 %vm181_vm0, %v583_v38 }
  0x20   :  { %295 = vmatpush.bf16.msra.mxu0 %v414_v14  ;;  %456 = vmatmul.msk.bf16.vlgmr.msrb.gmra.mxu1 %vm181_vm0, %v583_v38 }
  0x21   :  { %457 = vmatmul.msk.bf16.vlgmr.msrb.gmra.mxu2 %vm181_vm0, %v583_v38 }
  0x22   :  { %458 = vmatmul.msk.bf16.vlgmr.msrb.gmra.mxu3 %vm181_vm0, %v583_v38 }
  0x24   :  { %296 = vmatpush.bf16.msra.mxu0 %v378_v17 }
  0x2f   :  { %459 = vmatmul.msk.bf16.vlgmr.msra.gmra.mxu0 %vm181_vm0, %v583_v38 }
  0x8c   :  { %v194_v18 = vpop.f32.mrf.mxu0 }
  0x8d   :  { %vm302_vm1 = vcmp.gt.f32.partialorder %v194_v18, 0.0  ;;  %v311_v19 = vmul.f32 0.2, %v194_v18  ;;  %v207_v20 = vpop.f32.mrf.mxu1 }
  0x8e   :  { %vm303_vm2 = vcmp.gt.f32.partialorder %v207_v20, 0.0  ;;  %v312_v21 = vmul.f32 0.2, %v207_v20 }
  0x8f   :  { %v320_v22 = vsel %vm302_vm1, %v194_v18, %v311_v19 }
  0x90   :  { %v321_v23 = vsel %vm303_vm2, %v207_v20, %v312_v21 }
  0x91   :  { %v329_v24 = vpack.c.bf16 %v321_v23, %v320_v22 }
  0x93   :  { %334 = vst [vmem:[%s704_s2] sm:$0xff] %v329_v24 }
  0x94   :  { %v220_v25 = vpop.f32.mrf.mxu2  ;;  %v196_v26 = vpop.f32.mrf.mxu0 }
  0x95   :  { %vm304_vm3 = vcmp.gt.f32.partialorder %v220_v25, 0.0  ;;  %v313_v27 = vmul.f32 0.2, %v220_v25  ;;  %v233_v28 = vpop.f32.mrf.mxu3  ;;  %v209_v29 = vpop.f32.mrf.mxu1 }
  0x96   :  { %vm305_vm4 = vcmp.gt.f32.partialorder %v233_v28, 0.0  ;;  %v314_v30 = vmul.f32 0.2, %v233_v28 }
  0x97   :  { %v322_v31 = vsel %vm304_vm3, %v220_v25, %v313_v27 }
  0x98   :  { %v323_v32 = vsel %vm305_vm4, %v233_v28, %v314_v30 }
  0x99   :  { %v330_v33 = vpack.c.bf16 %v323_v32, %v322_v31 }
  0x9b   :  { %335 = vst [vmem:[%s704_s2 + $0x8] sm:$0xff] %v330_v33 }
  0x9c   :  { %v222_v34 = vpop.f32.mrf.mxu2  ;;  %v246_v36 = vpop.f32.mrf.mxu0 }
  0x9d   :  { %v235_v35 = vpop.f32.mrf.mxu3  ;;  %vm306_vm5 = vcmp.gt.f32.partialorder %v246_v36, 0.0  ;;  %v315_v37 = vmul.f32 0.2, %v246_v36  ;;  %v259_v38 = vpop.f32.mrf.mxu1 }
  0x9e   :  { %vm307_vm6 = vcmp.gt.f32.partialorder %v259_v38, 0.0  ;;  %v316_v39 = vmul.f32 0.2, %v259_v38 }
  0x9f   :  { %v324_v40 = vsel %vm306_vm5, %v246_v36, %v315_v37 }
  0xa0   :  { %v325_v41 = vsel %vm307_vm6, %v259_v38, %v316_v39 }
  0xa1   :  { %v331_v42 = vpack.c.bf16 %v325_v41, %v324_v40 }
  0xa3   :  { %336 = vst [vmem:[%s704_s2 + $0x10] sm:$0xff] %v331_v42 }
  0xa4   :  { %v272_v43 = vpop.f32.mrf.mxu2  ;;  %v248_v44 = vpop.f32.mrf.mxu0 }
  0xa5   :  { %vm308_vm7 = vcmp.gt.f32.partialorder %v272_v43, 0.0  ;;  %v317_v45 = vmul.f32 0.2, %v272_v43  ;;  %v285_v46 = vpop.f32.mrf.mxu3  ;;  %v261_v48 = vpop.f32.mrf.mxu1 }
  0xa6   :  { %vm309_vm8 = vcmp.gt.f32.partialorder %v285_v46, 0.0  ;;  %v318_v47 = vmul.f32 0.2, %v285_v46 }
  0xa7   :  { %v326_v49 = vsel %vm308_vm7, %v272_v43, %v317_v45 }
  0xa8   :  { %v327_v50 = vsel %vm309_vm8, %v285_v46, %v318_v47 }
  0xa9   :  { %v332_v51 = vpack.c.bf16 %v327_v50, %v326_v49 }
  0xab   :  { %337 = vst [vmem:[%s704_s2 + $0x18] sm:$0xff] %v332_v51 }
  0xac   :  { %v274_v52 = vpop.f32.mrf.mxu2  ;;  %v298_v54 = vpop.f32.mrf.mxu0 }
  0xad   :  { %v287_v53 = vpop.f32.mrf.mxu3  ;;  %vm310_vm9 = vcmp.gt.f32.partialorder %v298_v54, 0.0  ;;  %v319_v55 = vmul.f32 0.2, %v298_v54 }
  0xaf   :  { %v328_v56 = vsel %vm310_vm9, %v298_v54, %v319_v55 }
  0xb0   :  { %v333_v57 = vpack.c.bf16 %v328_v56, %v328_v56 }
  0xb2   :  { %338 = vst [vmem:[%s704_s2 + $0x20] sm:$0xf] %v333_v57 }
  0xb4   :  { %v300_v58 = vpop.f32.mrf.mxu0 }

// kernel: discriminator_forward.6
= control target key start
LH: loop header
LB: loop body
LE: loop exit
PB: predicated region body
PF: predicated region fallthrough
CT: control target
= control target key end

     0   :  { %s719_s1 = inlined_call_operand.vmem [shape: bf16[128,384], index: 1, kind: input, shape index: {}]   ;;  %s720_s0 = inlined_call_operand.vmem [shape: bf16[16,128], index: 0, kind: input, shape index: {}]   ;;  %s721_s2 = inlined_call_operand.vmem [shape: f32[16,1], index: 2, kind: input, shape index: {}]   ;;  %s722_s3 = inlined_call_operand.vmem [shape: f32[16,1], index: 3, kind: input, shape index: {}]   ;;  %s723_s4 = inlined_call_operand.vmem [shape: bf16[16,384], index: 4, kind: output, shape index: {}]  }
   0x1   :  { %v443_v0 = vld [vmem:[%s719_s1 + $0xa8] sm:$0xf]  ;;  %v476_v1 = vld [vmem:[%s719_s1 + $0xb0] sm:$0xf0]  ;;  %v475_v2 = vld [vmem:[%s719_s1 + $0xac] sm:$0xf] }
   0x2   :  { %v444_v3 = vor.u32 %v476_v1, %v443_v0  ;;  %v445_v4 = vld [vmem:[%s719_s1 + $0xb4] sm:$0xf0]  ;;  %v451_v5 = vld [vmem:[%s719_s1 + $0xb0] sm:$0xf]  ;;  %v477_v6 = vld [vmem:[%s719_s1 + $0xb8] sm:$0xf0] }
   0x3   :  { %v448_v7 = vor.u32 %v475_v2, %v445_v4  ;;  %v452_v8 = vor.u32 %v477_v6, %v451_v5  ;;  %v431_v9 = vld [vmem:[%s719_s1 + $0x90] sm:$0xf]  ;;  %v473_v10 = vld [vmem:[%s719_s1 + $0x98] sm:$0xf0]  ;;  %v472_v11 = vld [vmem:[%s719_s1 + $0x94] sm:$0xf] }
   0x4   :  { %185 = vmatpush.bf16.msra.mxu0 %v444_v3  ;;  %v432_v12 = vor.u32 %v473_v10, %v431_v9  ;;  %v433_v13 = vld [vmem:[%s719_s1 + $0x9c] sm:$0xf0]  ;;  %v439_v14 = vld [vmem:[%s719_s1 + $0x98] sm:$0xf]  ;;  %v474_v15 = vld [vmem:[%s719_s1 + $0xa0] sm:$0xf0] }
   0x5   :  { %199 = vmatpush.bf16.msra.mxu1 %v448_v7  ;;  %213 = vmatpush.bf16.msra.mxu2 %v452_v8  ;;  %v436_v16 = vor.u32 %v472_v11, %v433_v13  ;;  %v440_v17 = vor.u32 %v474_v15, %v439_v14  ;;  %v419_v18 = vld [vmem:[%s719_s1 + $0x78] sm:$0xf]  ;;  %v470_v19 = vld [vmem:[%s719_s1 + $0x80] sm:$0xf0]  ;;  %v469_v20 = vld [vmem:[%s719_s1 + $0x7c] sm:$0xf] }
   0x6   :  { %v421_v21 = vld [vmem:[%s719_s1 + $0x84] sm:$0xf0]  ;;  %v427_v22 = vld [vmem:[%s719_s1 + $0x80] sm:$0xf]  ;;  %v471_v23 = vld [vmem:[%s719_s1 + $0x88] sm:$0xf0]  ;;  %v420_v24 = vor.u32 %v470_v19, %v419_v18 }
   0x7   :  { %v424_v25 = vor.u32 %v469_v20, %v421_v21  ;;  %v428_v26 = vor.u32 %v471_v23, %v427_v22  ;;  %v407_v27 = vld [vmem:[%s719_s1 + $0x60] sm:$0xf]  ;;  %v467_v28 = vld [vmem:[%s719_s1 + $0x68] sm:$0xf0]  ;;  %v466_v29 = vld [vmem:[%s719_s1 + $0x64] sm:$0xf] }
   0x8   :  { %186 = vmatpush.bf16.msra.mxu0 %v432_v12  ;;  %v409_v30 = vld [vmem:[%s719_s1 + $0x6c] sm:$0xf0]  ;;  %v415_v31 = vld [vmem:[%s719_s1 + $0x68] sm:$0xf]  ;;  %v468_v32 = vld [vmem:[%s719_s1 + $0x70] sm:$0xf0]  ;;  %v408_v33 = vor.u32 %v467_v28, %v407_v27 }
   0x9   :  { %200 = vmatpush.bf16.msra.mxu1 %v436_v16  ;;  %214 = vmatpush.bf16.msra.mxu2 %v440_v17  ;;  %v412_v34 = vor.u32 %v466_v29, %v409_v30  ;;  %v416_v35 = vor.u32 %v468_v32, %v415_v31  ;;  %v395_v36 = vld [vmem:[%s719_s1 + $0x48] sm:$0xf]  ;;  %v464_v37 = vld [vmem:[%s719_s1 + $0x50] sm:$0xf0]  ;;  %v463_v38 = vld [vmem:[%s719_s1 + $0x4c] sm:$0xf] }
   0xa   :  { %v397_v39 = vld [vmem:[%s719_s1 + $0x54] sm:$0xf0]  ;;  %v403_v40 = vld [vmem:[%s719_s1 + $0x50] sm:$0xf]  ;;  %v465_v41 = vld [vmem:[%s719_s1 + $0x58] sm:$0xf0]  ;;  %v396_v42 = vor.u32 %v464_v37, %v395_v36 }
   0xb   :  { %v400_v43 = vor.u32 %v463_v38, %v397_v39  ;;  %v404_v44 = vor.u32 %v465_v41, %v403_v40  ;;  %v383_v45 = vld [vmem:[%s719_s1 + $0x30] sm:$0xf]  ;;  %v461_v46 = vld [vmem:[%s719_s1 + $0x38] sm:$0xf0]  ;;  %v460_v47 = vld [vmem:[%s719_s1 + $0x34] sm:$0xf] }
   0xc   :  { %187 = vmatpush.bf16.msra.mxu0 %v420_v24  ;;  %v385_v48 = vld [vmem:[%s719_s1 + $0x3c] sm:$0xf0]  ;;  %v391_v49 = vld [vmem:[%s719_s1 + $0x38] sm:$0xf]  ;;  %v462_v50 = vld [vmem:[%s719_s1 + $0x40] sm:$0xf0]  ;;  %v384_v51 = vor.u32 %v461_v46, %v383_v45 }
   0xd   :  { %201 = vmatpush.bf16.msra.mxu1 %v424_v25  ;;  %215 = vmatpush.bf16.msra.mxu2 %v428_v26  ;;  %v388_v52 = vor.u32 %v460_v47, %v385_v48  ;;  %v392_v53 = vor.u32 %v462_v50, %v391_v49  ;;  %v371_v54 = vld [vmem:[%s719_s1 + $0x18] sm:$0xf]  ;;  %v458_v55 = vld [vmem:[%s719_s1 + $0x20] sm:$0xf0]  ;;  %v457_v56 = vld [vmem:[%s719_s1 + $0x1c] sm:$0xf] }
   0xe   :  { %v373_v57 = vld [vmem:[%s719_s1 + $0x24] sm:$0xf0]  ;;  %v379_v58 = vld [vmem:[%s719_s1 + $0x20] sm:$0xf]  ;;  %v459_v59 = vld [vmem:[%s719_s1 + $0x28] sm:$0xf0]  ;;  %v372_v60 = vor.u32 %v458_v55, %v371_v54 }
   0xf   :  { %v376_v61 = vor.u32 %v457_v56, %v373_v57  ;;  %v380_v62 = vor.u32 %v459_v59, %v379_v58  ;;  %v359_v63 = vld [vmem:[%s719_s1] sm:$0xf]  ;;  %v455_v0 = vld [vmem:[%s719_s1 + $0x8] sm:$0xf0]  ;;  %v454_v1 = vld [vmem:[%s719_s1 + $0x4] sm:$0xf] }
  0x10   :  { %188 = vmatpush.bf16.msra.mxu0 %v408_v33  ;;  %v361_v2 = vld [vmem:[%s719_s1 + $0xc] sm:$0xf0]  ;;  %v367_v3 = vld [vmem:[%s719_s1 + $0x8] sm:$0xf]  ;;  %v456_v4 = vld [vmem:[%s719_s1 + $0x10] sm:$0xf0]  ;;  %v360_v5 = vor.u32 %v455_v0, %v359_v63 }
  0x11   :  { %202 = vmatpush.bf16.msra.mxu1 %v412_v34  ;;  %216 = vmatpush.bf16.msra.mxu2 %v416_v35  ;;  %v364_v6 = vor.u32 %v454_v1, %v361_v2  ;;  %v368_v7 = vor.u32 %v456_v4, %v367_v3  ;;  %v453_v8 = vld [vmem:[%s720_s0] sm:$0xff]  ;;  %v486_v29 = vmov 0   ;;  %v260_v63 = vld [vmem:[%s721_s2 + $0x8] sm:$0xff] }
  0x12   :  { %479 = vset.pattern.permute.xlu2 %v486_v29  ;;  %480 = vset.pattern.permute.xlu0 %v486_v29  ;;  %v285_v59 = vld [vmem:[%s722_s3] sm:$0xff]  ;;  %v286_v3 = vld [vmem:[%s722_s3 + $0x8] sm:$0xff] }
  0x13   :  { %481 = vset.pattern.permute.xlu1 %v486_v29 }
  0x14   :  { %189 = vmatpush.bf16.msra.mxu0 %v396_v42 }
  0x15   :  { %203 = vmatpush.bf16.msra.mxu1 %v400_v43  ;;  %217 = vmatpush.bf16.msra.mxu2 %v404_v44 }
  0x18   :  { %190 = vmatpush.bf16.msra.mxu0 %v384_v51 }
  0x19   :  { %204 = vmatpush.bf16.msra.mxu1 %v388_v52  ;;  %218 = vmatpush.bf16.msra.mxu2 %v392_v53  ;;  %v259_v53 = vld [vmem:[%s721_s2] sm:$0xff] }
  0x1c   :  { %191 = vmatpush.bf16.msra.mxu0 %v372_v60 }
  0x1d   :  { %205 = vmatpush.bf16.msra.mxu1 %v376_v61  ;;  %219 = vmatpush.bf16.msra.mxu2 %v380_v62 }
  0x20   :  { %192 = vmatpush.bf16.msra.mxu0 %v360_v5 }
  0x21   :  { %206 = vmatpush.bf16.msra.mxu1 %v364_v6  ;;  %220 = vmatpush.bf16.msra.mxu2 %v368_v7 }
  0x23   :  { %193 = vmatmul.bf16.vlgmr.msra.gmra.mxu0 %v453_v8 }
  0x24   :  { %207 = vmatmul.bf16.vlgmr.msra.gmra.mxu1 %v453_v8  ;;  %221 = vmatmul.bf16.vlgmr.msra.gmra.mxu2 %v453_v8 }
  0xa0   :  { %v659_v9 = vpop.f32.mrf.mxu0 }
  0xa1   :  { %v661_v10 = vpop.f32.mrf.mxu1  ;;  %v235_v11 = vmul.f32 %v659_v9, %v659_v9 }
  0xa2   :  { %v236_v12 = vmul.f32 %v661_v10, %v661_v10  ;;  %v227_v13 = vadd.f32 %v661_v10, %v659_v9 }
  0xa4   :  { %v241_v14 = vadd.f32 %v236_v12, %v235_v11 }
  0xa7   :  { %v669_v15 = vpop.f32.mrf.mxu2 }
  0xa8   :  { %v228_v16 = vadd.f32 %v227_v13, %v669_v15  ;;  %v237_v17 = vmul.f32 %v669_v15, %v669_v15  ;;  %v674_v18 = vpop.f32.mrf.mxu0 }
  0xa9   :  { %v676_v19 = vpop.f32.mrf.mxu1  ;;  %v238_v21 = vmul.f32 %v674_v18, %v674_v18 }
  0xaa   :  { %229 = vadd.xlane.f32.xlu0 %v228_v16  ;;  %v242_v20 = vadd.f32 %v241_v14, %v237_v17  ;;  %v239_v22 = vmul.f32 %v676_v19, %v676_v19  ;;  %v231_v23 = vadd.f32 %v676_v19, %v674_v18 }
  0xac   :  { %243 = vadd.xlane.f32.xlu1 %v242_v20  ;;  %v245_v27 = vadd.f32 %v239_v22, %v238_v21 }
  0xaf   :  { %v684_v24 = vpop.f32.mrf.mxu2 }
  0xb0   :  { %v240_v25 = vmul.f32 %v684_v24, %v684_v24  ;;  %v232_v26 = vadd.f32 %v231_v23, %v684_v24 }
  0xb2   :  { %233 = vadd.xlane.f32.xlu0 %v232_v26  ;;  %v246_v28 = vadd.f32 %v245_v27, %v240_v25 }
  0xb4   :  { %247 = vadd.xlane.f32.xlu1 %v246_v28 }
 0x11d   :  { %v230_v30 = vpop.xlane.xlu0 %229 }
 0x11e   :  { %v249_v31 = vmul.f32 0.0034722222, %v230_v30 }
 0x11f   :  { %v244_v32 = vpop.xlane.xlu1 %243 }
 0x120   :  { %v253_v33 = vmul.f32 %v249_v31, %v249_v31  ;;  %v251_v34 = vmul.f32 0.0034722222, %v244_v32 }
 0x122   :  { %v255_v35 = vsub.f32 %v251_v34, %v253_v33 }
 0x124   :  { %v257_v36 = vmax.f32 %v255_v35, 0.0 }
 0x125   :  { %v234_v37 = vpop.xlane.xlu0 %233 }
 0x126   :  { %v261_v38 = vadd.f32 1e-05, %v257_v36  ;;  %v250_v39 = vmul.f32 0.0034722222, %v234_v37 }
 0x127   :  { %v248_v40 = vpop.xlane.xlu1 %247 }
 0x128   :  { %482 = vrsqrt.f32 %v261_v38  ;;  %v254_v41 = vmul.f32 %v250_v39, %v250_v39  ;;  %v252_v42 = vmul.f32 0.0034722222, %v248_v40  ;;  %vm269_vm1 = vweird.f32 %v261_v38 }
 0x12a   :  { %v256_v43 = vsub.f32 %v252_v42, %v254_v41 }
 0x12c   :  { %v258_v44 = vmax.f32 %v256_v43, 0.0 }
 0x12e   :  { %v483_v45 = vpop.eup %482  ;;  %v262_v46 = vadd.f32 1e-05, %v258_v44 }
 0x12f   :  { %v264_v47 = vmul.f32 %v483_v45, %v261_v38  ;;  %vm270_vm0 = vweird.f32 %v483_v45 }
 0x130   :  { %484 = vrsqrt.f32 %v262_v46  ;;  %vm271_vm2 = vmor %vm269_vm1, %vm270_vm0  ;;  %vm279_vm4 = vweird.f32 %v262_v46 }
 0x131   :  { %v265_v48 = vmul.f32 %v483_v45, %v264_v47 }
 0x133   :  { %v266_v49 = vmul.f32 0.5, %v265_v48 }
 0x135   :  { %v267_v50 = vsub.f32 1.5, %v266_v49 }
 0x136   :  { %v485_v51 = vpop.eup %484 }
 0x137   :  { %v274_v52 = vmul.f32 %v485_v51, %v262_v46  ;;  %v268_v54 = vmul.f32 %v483_v45, %v267_v50  ;;  %vm280_vm3 = vweird.f32 %v485_v51 }
 0x138   :  { %vm281_vm5 = vmor %vm279_vm4, %vm280_vm3 }
 0x139   :  { %v275_v55 = vmul.f32 %v485_v51, %v274_v52  ;;  %v272_v56 = vsel %vm271_vm2, %v483_v45, %v268_v54 }
 0x13a   :  { %v283_v57 = vmul.f32 %v272_v56, %v259_v53 }
 0x13b   :  { %v276_v58 = vmul.f32 0.5, %v275_v55 }
 0x13c   :  { %293 = vperm.xlu2 %479, %v283_v57   ;;  %v287_v60 = vmul.f32 %v283_v57, %v249_v31 }
 0x13d   :  { %v277_v61 = vsub.f32 1.5, %v276_v58 }
 0x13e   :  { %v289_v62 = vsub.f32 %v285_v59, %v287_v60 }
 0x13f   :  { %v278_v0 = vmul.f32 %v485_v51, %v277_v61 }
 0x140   :  { %309 = vperm.xlu0 %480, %v289_v62  }
 0x141   :  { %v282_v1 = vsel %vm281_vm5, %v485_v51, %v278_v0 }
 0x142   :  { %v284_v2 = vmul.f32 %v282_v1, %v260_v63 }
 0x144   :  { %298 = vperm.xlu2 %479, %v284_v2   ;;  %v288_v4 = vmul.f32 %v284_v2, %v250_v39 }
 0x146   :  { %v290_v5 = vsub.f32 %v286_v3, %v288_v4 }
 0x148   :  { %314 = vperm.xlu1 %481, %v290_v5  }
 0x196   :  { %v294_v6 = vpop.permute.xlu2 %293 }
 0x197   :  { %v301_v7 = vmul.f32 %v294_v6, %v659_v9  ;;  %v302_v8 = vmul.f32 %v294_v6, %v661_v10  ;;  %v303_v11 = vmul.f32 %v294_v6, %v669_v15 }
 0x19e   :  { %v299_v17 = vpop.permute.xlu2 %298 }
 0x19f   :  { %v304_v25 = vmul.f32 %v299_v17, %v674_v18  ;;  %v305_v10 = vmul.f32 %v299_v17, %v676_v19  ;;  %v306_v15 = vmul.f32 %v299_v17, %v684_v24 }
 0x1b2   :  { %v310_v12 = vpop.permute.xlu0 %309 }
 0x1b3   :  { %v317_v13 = vadd.f32 %v310_v12, %v301_v7  ;;  %v318_v14 = vadd.f32 %v310_v12, %v302_v8  ;;  %v319_v16 = vadd.f32 %v310_v12, %v303_v11 }
 0x1b5   :  { %vm323_vm6 = vcmp.gt.f32.partialorder %v317_v13, 0.0  ;;  %vm324_vm7 = vcmp.gt.f32.partialorder %v318_v14, 0.0  ;;  %vm325_vm8 = vcmp.gt.f32.partialorder %v319_v16, 0.0  ;;  %v329_v20 = vmul.f32 0.2, %v317_v13 }
 0x1b6   :  { %v330_v21 = vmul.f32 0.2, %v318_v14  ;;  %v331_v22 = vmul.f32 0.2, %v319_v16 }
 0x1b7   :  { %v335_v23 = vsel %vm323_vm6, %v317_v13, %v329_v20 }
 0x1b8   :  { %v336_v26 = vsel %vm324_vm7, %v318_v14, %v330_v21  ;;  %v337_v9 = vsel %vm325_vm8, %v319_v16, %v331_v22 }
 0x1b9   :  { %v341_v27 = vpack.c.bf16 %v336_v26, %v335_v23  ;;  %v342_v28 = vpack.c.bf16 %v337_v9, %v337_v9 }
 0x1ba   :  { %v315_v29 = vpop.permute.xlu1 %314 }
 0x1bb   :  { %345 = vst [vmem:[%s723_s4] sm:$0xff] %v341_v27  ;;  %v320_v30 = vadd.f32 %v315_v29, %v304_v25  ;;  %v321_v31 = vadd.f32 %v315_v29, %v305_v10  ;;  %v322_v32 = vadd.f32 %v315_v29, %v306_v15 }
 0x1bc   :  { %346 = vst [vmem:[%s723_s4 + $0x8] sm:$0xf] %v342_v28 }
 0x1bd   :  { %vm326_vm9 = vcmp.gt.f32.partialorder %v320_v30, 0.0  ;;  %vm327_vm10 = vcmp.gt.f32.partialorder %v321_v31, 0.0  ;;  %vm328_vm11 = vcmp.gt.f32.partialorder %v322_v32, 0.0  ;;  %v332_v18 = vmul.f32 0.2, %v320_v30 }
 0x1be   :  { %v333_v19 = vmul.f32 0.2, %v321_v31  ;;  %v334_v24 = vmul.f32 0.2, %v322_v32 }
 0x1bf   :  { %v338_v33 = vsel %vm326_vm9, %v320_v30, %v332_v18 }
 0x1c0   :  { %v339_v34 = vsel %vm327_vm10, %v321_v31, %v333_v19  ;;  %v340_v35 = vsel %vm328_vm11, %v322_v32, %v334_v24 }
 0x1c1   :  { %v343_v36 = vpack.c.bf16 %v339_v34, %v338_v33  ;;  %v344_v37 = vpack.c.bf16 %v340_v35, %v340_v35 }
 0x1c3   :  { %347 = vst [vmem:[%s723_s4 + $0xc] sm:$0xff] %v343_v36 }
 0x1c4   :  { %348 = vst [vmem:[%s723_s4 + $0x14] sm:$0xf] %v344_v37 }

// kernel: discriminator_forward.7
= control target key start
LH: loop header
LB: loop body
LE: loop exit
PB: predicated region body
PF: predicated region fallthrough
CT: control target
= control target key end

     0   :  { %v522_v44 = vmov 0   ;;  %s689_s1 = inlined_call_operand.vmem [shape: bf16[256,128], index: 1, kind: input, shape index: {}]   ;;  %s690_s0 = inlined_call_operand.vmem [shape: bf16[32,256], index: 0, kind: input, shape index: {}]   ;;  %s691_s2 = inlined_call_operand.vmem [shape: f32[32,1], index: 2, kind: input, shape index: {}]   ;;  %s692_s3 = inlined_call_operand.vmem [shape: f32[32,1], index: 3, kind: input, shape index: {}]   ;;  %s693_s4 = inlined_call_operand.vmem [shape: bf16[32,128], index: 4, kind: output, shape index: {}]  }
   0x1   :  { %v474_v0 = vld [vmem:[%s689_s1 + $0x38] sm:$0xff]  ;;  %v473_v2 = vld [vmem:[%s689_s1 + $0x30] sm:$0xff]  ;;  %v472_v4 = vld [vmem:[%s689_s1 + $0x28] sm:$0xff]  ;;  %511 = vset.pattern.permute.xlu2 %v522_v44  ;;  %512 = vset.pattern.permute.xlu0 %v522_v44 }
   0x2   :  { %v482_v1 = vld [vmem:[%s689_s1 + $0x78] sm:$0xff]  ;;  %169 = vmatpush.bf16.msra.mxu0 %v474_v0  ;;  %494 = vmatpush.bf16.msra.mxu2 %v474_v0  ;;  %v481_v3 = vld [vmem:[%s689_s1 + $0x70] sm:$0xff]  ;;  %v480_v5 = vld [vmem:[%s689_s1 + $0x68] sm:$0xff] }
   0x3   :  { %188 = vmatpush.bf16.msra.mxu1 %v482_v1  ;;  %502 = vmatpush.bf16.msra.mxu3 %v482_v1  ;;  %v471_v6 = vld [vmem:[%s689_s1 + $0x20] sm:$0xff]  ;;  %v470_v8 = vld [vmem:[%s689_s1 + $0x18] sm:$0xff]  ;;  %v469_v10 = vld [vmem:[%s689_s1 + $0x10] sm:$0xff] }
   0x4   :  { %v479_v7 = vld [vmem:[%s689_s1 + $0x60] sm:$0xff]  ;;  %v478_v9 = vld [vmem:[%s689_s1 + $0x58] sm:$0xff]  ;;  %v477_v11 = vld [vmem:[%s689_s1 + $0x50] sm:$0xff]  ;;  %513 = vset.pattern.permute.xlu1 %v522_v44 }
   0x5   :  { %v468_v12 = vld [vmem:[%s689_s1 + $0x8] sm:$0xff]  ;;  %v467_v14 = vld [vmem:[%s689_s1] sm:$0xff]  ;;  %v393_v18 = vld [vmem:[%s690_s0 + $0x10] sm:$0xf] }
   0x6   :  { %170 = vmatpush.bf16.msra.mxu0 %v473_v2  ;;  %495 = vmatpush.bf16.msra.mxu2 %v473_v2  ;;  %v476_v13 = vld [vmem:[%s689_s1 + $0x48] sm:$0xff]  ;;  %v475_v15 = vld [vmem:[%s689_s1 + $0x40] sm:$0xff]  ;;  %v466_v19 = vld [vmem:[%s690_s0 + $0x14] sm:$0xf0] }
   0x7   :  { %189 = vmatpush.bf16.msra.mxu1 %v481_v3  ;;  %503 = vmatpush.bf16.msra.mxu3 %v481_v3  ;;  %v385_v16 = vld [vmem:[%s690_s0] sm:$0xf]  ;;  %v464_v17 = vld [vmem:[%s690_s0 + $0x4] sm:$0xf0]  ;;  %v463_v20 = vld [vmem:[%s690_s0 + $0x4] sm:$0xf]  ;;  %v394_v25 = vor.u32 %v466_v19, %v393_v18 }
   0x8   :  { %v387_v21 = vld [vmem:[%s690_s0 + $0x8] sm:$0xf0]  ;;  %v465_v22 = vld [vmem:[%s690_s0 + $0x14] sm:$0xf]  ;;  %v395_v23 = vld [vmem:[%s690_s0 + $0x18] sm:$0xf0]  ;;  %v386_v24 = vor.u32 %v464_v17, %v385_v16 }
   0x9   :  { %v390_v26 = vor.u32 %v463_v20, %v387_v21  ;;  %v398_v27 = vor.u32 %v465_v22, %v395_v23  ;;  %v247_v18 = vld [vmem:[%s691_s2] sm:$0xff] }
   0xa   :  { %171 = vmatpush.bf16.msra.mxu0 %v472_v4  ;;  %496 = vmatpush.bf16.msra.mxu2 %v472_v4 }
   0xb   :  { %190 = vmatpush.bf16.msra.mxu1 %v480_v5  ;;  %504 = vmatpush.bf16.msra.mxu3 %v480_v5 }
   0xe   :  { %172 = vmatpush.bf16.msra.mxu0 %v471_v6  ;;  %497 = vmatpush.bf16.msra.mxu2 %v471_v6 }
   0xf   :  { %191 = vmatpush.bf16.msra.mxu1 %v479_v7  ;;  %505 = vmatpush.bf16.msra.mxu3 %v479_v7 }
  0x12   :  { %173 = vmatpush.bf16.msra.mxu0 %v470_v8  ;;  %498 = vmatpush.bf16.msra.mxu2 %v470_v8 }
  0x13   :  { %192 = vmatpush.bf16.msra.mxu1 %v478_v9  ;;  %506 = vmatpush.bf16.msra.mxu3 %v478_v9 }
  0x16   :  { %174 = vmatpush.bf16.msra.mxu0 %v469_v10  ;;  %499 = vmatpush.bf16.msra.mxu2 %v469_v10 }
  0x17   :  { %193 = vmatpush.bf16.msra.mxu1 %v477_v11  ;;  %507 = vmatpush.bf16.msra.mxu3 %v477_v11 }
  0x1a   :  { %175 = vmatpush.bf16.msra.mxu0 %v468_v12  ;;  %500 = vmatpush.bf16.msra.mxu2 %v468_v12 }
  0x1b   :  { %194 = vmatpush.bf16.msra.mxu1 %v476_v13  ;;  %508 = vmatpush.bf16.msra.mxu3 %v476_v13 }
  0x1e   :  { %176 = vmatpush.bf16.msra.mxu0 %v467_v14  ;;  %501 = vmatpush.bf16.msra.mxu2 %v467_v14 }
  0x1f   :  { %195 = vmatpush.bf16.msra.mxu1 %v475_v15  ;;  %509 = vmatpush.bf16.msra.mxu3 %v475_v15 }
  0x21   :  { %177 = vmatmul.bf16.vlgmr.msra.gmra.mxu0 %v386_v24  ;;  %182 = vmatmul.bf16.vlgmr.msra.gmra.mxu2 %v394_v25 }
  0x22   :  { %196 = vmatmul.bf16.vlgmr.msra.gmra.mxu1 %v390_v26  ;;  %201 = vmatmul.bf16.vlgmr.msra.gmra.mxu3 %v398_v27 }
  0x9e   :  { %v178_v28 = vpop.f32.mrf.mxu0 }
  0x9f   :  { %v197_v29 = vpop.f32.mrf.mxu1 }
  0xa0   :  { %v620_v30 = vadd.f32 %v197_v29, %v178_v28 }
  0xa2   :  { %207 = vadd.xlane.f32.xlu0 %v620_v30  ;;  %v215_v31 = vmul.f32 %v620_v30, %v620_v30 }
  0xa4   :  { %219 = vadd.xlane.f32.xlu2 %v215_v31  ;;  %v183_v32 = vpop.f32.mrf.mxu2 }
  0xa5   :  { %v202_v33 = vpop.f32.mrf.mxu3 }
  0xa6   :  { %v625_v34 = vadd.f32 %v202_v33, %v183_v32  ;;  %v180_v35 = vpop.f32.mrf.mxu0  ;;  %v299_v32 = vld [vmem:[%s692_s3] sm:$0xff]  ;;  %v248_v33 = vld [vmem:[%s691_s2 + $0x8] sm:$0xff] }
  0xa7   :  { %v199_v36 = vpop.f32.mrf.mxu1 }
  0xa8   :  { %v627_v37 = vadd.f32 %v199_v36, %v180_v35  ;;  %211 = vadd.xlane.f32.xlu1 %v625_v34  ;;  %v217_v42 = vmul.f32 %v625_v34, %v625_v34 }
  0xaa   :  { %209 = vadd.xlane.f32.xlu0 %v627_v37  ;;  %v216_v38 = vmul.f32 %v627_v37, %v627_v37 }
  0xac   :  { %221 = vadd.xlane.f32.xlu2 %v216_v38  ;;  %v185_v39 = vpop.f32.mrf.mxu2 }
  0xad   :  { %v204_v40 = vpop.f32.mrf.mxu3 }
  0xae   :  { %v633_v41 = vadd.f32 %v204_v40, %v185_v39 }
  0xb0   :  { %213 = vadd.xlane.f32.xlu1 %v633_v41  ;;  %v218_v43 = vmul.f32 %v633_v41, %v633_v41 }
  0xb2   :  { %223 = vadd.xlane.f32.xlu0 %v217_v42 }
  0xb8   :  { %225 = vadd.xlane.f32.xlu1 %v218_v43 }
 0x115   :  { %v208_v45 = vpop.xlane.xlu0 %207 }
 0x116   :  { %v227_v46 = vmul.f32 0.013888889, %v208_v45 }
 0x117   :  { %v220_v47 = vpop.xlane.xlu2 %219 }
 0x118   :  { %v235_v48 = vmul.f32 %v227_v46, %v227_v46  ;;  %v231_v49 = vmul.f32 0.013888889, %v220_v47 }
 0x11a   :  { %v239_v50 = vsub.f32 %v231_v49, %v235_v48 }
 0x11b   :  { %v212_v51 = vpop.xlane.xlu1 %211 }
 0x11c   :  { %v243_v52 = vmax.f32 %v239_v50, 0.0  ;;  %v644_v59 = vmul.f32 0.013888889, %v212_v51 }
 0x11d   :  { %v210_v53 = vpop.xlane.xlu0 %209 }
 0x11e   :  { %v251_v54 = vadd.f32 1e-05, %v243_v52  ;;  %v640_v55 = vmul.f32 0.013888889, %v210_v53  ;;  %v237_v1 = vmul.f32 %v644_v59, %v644_v59  ;;  %v250_v52 = vld [vmem:[%s691_s2 + $0x18] sm:$0xff] }
 0x11f   :  { %v222_v56 = vpop.xlane.xlu2 %221 }
 0x120   :  { %514 = vrsqrt.f32 %v251_v54  ;;  %v236_v57 = vmul.f32 %v640_v55, %v640_v55  ;;  %v232_v58 = vmul.f32 0.013888889, %v222_v56  ;;  %vm261_vm1 = vweird.f32 %v251_v54 }
 0x122   :  { %v240_v60 = vsub.f32 %v232_v58, %v236_v57  ;;  %v300_v57 = vld [vmem:[%s692_s3 + $0x8] sm:$0xff] }
 0x123   :  { %v214_v61 = vpop.xlane.xlu1 %213 }
 0x124   :  { %v244_v62 = vmax.f32 %v240_v60, 0.0  ;;  %v648_v5 = vmul.f32 0.013888889, %v214_v61 }
 0x125   :  { %v224_v63 = vpop.xlane.xlu0 %223 }
 0x126   :  { %v515_v0 = vpop.eup %514  ;;  %v252_v2 = vadd.f32 1e-05, %v244_v62  ;;  %v233_v3 = vmul.f32 0.013888889, %v224_v63  ;;  %v238_v11 = vmul.f32 %v648_v5, %v648_v5  ;;  %v301_v62 = vld [vmem:[%s692_s3 + $0x10] sm:$0xff] }
 0x127   :  { %v256_v4 = vmul.f32 %v515_v0, %v251_v54  ;;  %vm262_vm0 = vweird.f32 %v515_v0 }
 0x128   :  { %516 = vrsqrt.f32 %v252_v2  ;;  %v241_v6 = vsub.f32 %v233_v3, %v237_v1  ;;  %vm263_vm2 = vmor %vm261_vm1, %vm262_vm0  ;;  %vm271_vm4 = vweird.f32 %v252_v2 }
 0x129   :  { %v257_v7 = vmul.f32 %v515_v0, %v256_v4 }
 0x12a   :  { %v245_v8 = vmax.f32 %v241_v6, 0.0 }
 0x12b   :  { %v258_v9 = vmul.f32 0.5, %v257_v7  ;;  %v226_v10 = vpop.xlane.xlu1 %225 }
 0x12c   :  { %v253_v12 = vadd.f32 1e-05, %v245_v8  ;;  %v234_v13 = vmul.f32 0.013888889, %v226_v10 }
 0x12d   :  { %v259_v14 = vsub.f32 1.5, %v258_v9 }
 0x12e   :  { %v517_v15 = vpop.eup %516  ;;  %518 = vrsqrt.f32 %v253_v12  ;;  %v242_v16 = vsub.f32 %v234_v13, %v238_v11  ;;  %vm281_vm7 = vweird.f32 %v253_v12 }
 0x12f   :  { %v266_v17 = vmul.f32 %v517_v15, %v252_v2  ;;  %v260_v19 = vmul.f32 %v515_v0, %v259_v14  ;;  %vm272_vm3 = vweird.f32 %v517_v15 }
 0x130   :  { %v246_v20 = vmax.f32 %v242_v16, 0.0  ;;  %vm273_vm5 = vmor %vm271_vm4, %vm272_vm3 }
 0x131   :  { %v267_v21 = vmul.f32 %v517_v15, %v266_v17  ;;  %v264_v22 = vsel %vm263_vm2, %v515_v0, %v260_v19 }
 0x132   :  { %v254_v23 = vadd.f32 1e-05, %v246_v20  ;;  %v295_v24 = vmul.f32 %v264_v22, %v247_v18 }
 0x133   :  { %v268_v25 = vmul.f32 0.5, %v267_v21 }
 0x134   :  { %v519_v26 = vpop.eup %518  ;;  %520 = vrsqrt.f32 %v254_v23  ;;  %313 = vperm.xlu2 %511, %v295_v24   ;;  %v303_v29 = vmul.f32 %v295_v24, %v227_v46  ;;  %v249_v46 = vld [vmem:[%s691_s2 + $0x10] sm:$0xff]  ;;  %vm291_vm10 = vweird.f32 %v254_v23 }
 0x135   :  { %v269_v27 = vsub.f32 1.5, %v268_v25  ;;  %v276_v28 = vmul.f32 %v519_v26, %v253_v12  ;;  %vm282_vm6 = vweird.f32 %v519_v26 }
 0x136   :  { %v307_v40 = vsub.f32 %v299_v32, %v303_v29  ;;  %vm283_vm8 = vmor %vm281_vm7, %vm282_vm6 }
 0x137   :  { %v277_v31 = vmul.f32 %v519_v26, %v276_v28  ;;  %v270_v35 = vmul.f32 %v517_v15, %v269_v27 }
 0x139   :  { %v278_v36 = vmul.f32 0.5, %v277_v31  ;;  %v274_v38 = vsel %vm273_vm5, %v517_v15, %v270_v35 }
 0x13a   :  { %v521_v39 = vpop.eup %520  ;;  %v296_v42 = vmul.f32 %v274_v38, %v248_v33 }
 0x13b   :  { %v279_v43 = vsub.f32 1.5, %v278_v36  ;;  %v286_v44 = vmul.f32 %v521_v39, %v254_v23  ;;  %vm292_vm9 = vweird.f32 %v521_v39 }
 0x13c   :  { %337 = vperm.xlu2 %511, %v307_v40   ;;  %318 = vperm.xlu0 %512, %v296_v42   ;;  %vm293_vm11 = vmor %vm291_vm10, %vm292_vm9  ;;  %v304_v54 = vmul.f32 %v296_v42, %v640_v55  ;;  %v302_v55 = vld [vmem:[%s692_s3 + $0x18] sm:$0xff] }
 0x13d   :  { %v287_v45 = vmul.f32 %v521_v39, %v286_v44  ;;  %v280_v47 = vmul.f32 %v519_v26, %v279_v43 }
 0x13e   :  { %v308_v60 = vsub.f32 %v300_v57, %v304_v54 }
 0x13f   :  { %v288_v48 = vmul.f32 0.5, %v287_v45  ;;  %v284_v49 = vsel %vm283_vm8, %v519_v26, %v280_v47 }
 0x140   :  { %v297_v50 = vmul.f32 %v284_v49, %v249_v46 }
 0x141   :  { %v289_v51 = vsub.f32 1.5, %v288_v48 }
 0x142   :  { %323 = vperm.xlu1 %513, %v297_v50   ;;  %v305_v61 = vmul.f32 %v297_v50, %v644_v59 }
 0x143   :  { %v290_v53 = vmul.f32 %v521_v39, %v289_v51 }
 0x144   :  { %v309_v0 = vsub.f32 %v301_v62, %v305_v61 }
 0x145   :  { %v294_v56 = vsel %vm293_vm11, %v521_v39, %v290_v53 }
 0x146   :  { %v298_v58 = vmul.f32 %v294_v56, %v250_v52 }
 0x148   :  { %328 = vperm.xlu2 %511, %v298_v58   ;;  %v306_v63 = vmul.f32 %v298_v58, %v648_v5 }
 0x14a   :  { %342 = vperm.xlu1 %513, %v308_v60   ;;  %v310_v1 = vsub.f32 %v302_v55, %v306_v63 }
 0x150   :  { %347 = vperm.xlu2 %511, %v309_v0  }
 0x152   :  { %352 = vperm.xlu1 %513, %v310_v1  }
 0x18e   :  { %v314_v2 = vpop.permute.xlu2 %313 }
 0x18f   :  { %v331_v59 = vmul.f32 %v314_v2, %v620_v30 }
 0x196   :  { %v338_v3 = vpop.permute.xlu2 %337 }
 0x197   :  { %v355_v8 = vadd.f32 %v338_v3, %v331_v59 }
 0x199   :  { %v363_v5 = vmul.f32 0.2, %v355_v8  ;;  %vm359_vm12 = vcmp.gt.f32.partialorder %v355_v8, 0.0 }
 0x19b   :  { %v367_v15 = vsel %vm359_vm12, %v355_v8, %v363_v5 }
 0x1a2   :  { %v329_v6 = vpop.permute.xlu2 %328 }
 0x1a3   :  { %v334_v19 = vmul.f32 %v329_v6, %v633_v41 }
 0x1aa   :  { %v348_v14 = vpop.permute.xlu2 %347 }
 0x1ae   :  { %v319_v7 = vpop.permute.xlu0 %318 }
 0x1af   :  { %v332_v9 = vmul.f32 %v319_v7, %v627_v37 }
 0x1b4   :  { %v324_v4 = vpop.permute.xlu1 %323 }
 0x1b5   :  { %v333_v11 = vmul.f32 %v324_v4, %v625_v34 }
 0x1b7   :  { %v357_v16 = vadd.f32 %v348_v14, %v333_v11 }
 0x1b9   :  { %v365_v37 = vmul.f32 0.2, %v357_v16  ;;  %vm361_vm14 = vcmp.gt.f32.partialorder %v357_v16, 0.0 }
 0x1bb   :  { %v369_v21 = vsel %vm361_vm14, %v357_v16, %v365_v37 }
 0x1bc   :  { %v343_v10 = vpop.permute.xlu1 %342 }
 0x1bd   :  { %v356_v12 = vadd.f32 %v343_v10, %v332_v9 }
 0x1bf   :  { %vm360_vm13 = vcmp.gt.f32.partialorder %v356_v12, 0.0  ;;  %v364_v13 = vmul.f32 0.2, %v356_v12 }
 0x1c1   :  { %v368_v17 = vsel %vm360_vm13, %v356_v12, %v364_v13 }
 0x1c2   :  { %v486_v18 = vpack.c.bf16 %v368_v17, %v367_v15 }
 0x1c4   :  { %487 = vst [vmem:[%s693_s4] sm:$0xff] %v486_v18   ;;  %v353_v30 = vpop.permute.xlu1 %352 }
 0x1c5   :  { %v358_v20 = vadd.f32 %v353_v30, %v334_v19 }
 0x1c7   :  { %vm362_vm15 = vcmp.gt.f32.partialorder %v358_v20, 0.0  ;;  %v366_v34 = vmul.f32 0.2, %v358_v20 }
 0x1c9   :  { %v370_v22 = vsel %vm362_vm15, %v358_v20, %v366_v34 }
 0x1ca   :  { %v491_v23 = vpack.c.bf16 %v370_v22, %v369_v21 }
 0x1cc   :  { %493 = vst [vmem:[%s693_s4 + $0x8] sm:$0xff] %v491_v23  }

// kernel: discriminator_forward.8
= control target key start
LH: loop header
LB: loop body
LE: loop exit
PB: predicated region body
PF: predicated region fallthrough
CT: control target
= control target key end

     0   :  { %s1487_s1 = inlined_call_operand.vmem [shape: bf16[512,128], index: 1, kind: input, shape index: {}]   ;;  %s1488_s0 = inlined_call_operand.vmem [shape: bf16[64,512], index: 0, kind: input, shape index: {}]   ;;  %s1489_s2 = inlined_call_operand.vmem [shape: f32[64,1], index: 2, kind: input, shape index: {}]   ;;  %s1490_s3 = inlined_call_operand.vmem [shape: f32[64,1], index: 3, kind: input, shape index: {}]   ;;  %s1491_s4 = inlined_call_operand.vmem [shape: bf16[64,128], index: 4, kind: output, shape index: {}]  }
   0x1   :  { %v1048_v0 = vld [vmem:[%s1487_s1 + $0x38] sm:$0xff]  ;;  %v1047_v4 = vld [vmem:[%s1487_s1 + $0x30] sm:$0xff]  ;;  %v1046_v8 = vld [vmem:[%s1487_s1 + $0x28] sm:$0xff] }
   0x2   :  { %v1056_v1 = vld [vmem:[%s1487_s1 + $0x78] sm:$0xff]  ;;  %369 = vmatpush.bf16.msra.mxu0 %v1048_v0  ;;  %v1055_v5 = vld [vmem:[%s1487_s1 + $0x70] sm:$0xff]  ;;  %v1054_v9 = vld [vmem:[%s1487_s1 + $0x68] sm:$0xff] }
   0x3   :  { %v1064_v2 = vld [vmem:[%s1487_s1 + $0xb8] sm:$0xff]  ;;  %398 = vmatpush.bf16.msra.mxu1 %v1056_v1  ;;  %v1063_v6 = vld [vmem:[%s1487_s1 + $0xb0] sm:$0xff]  ;;  %v1062_v10 = vld [vmem:[%s1487_s1 + $0xa8] sm:$0xff] }
   0x4   :  { %v1072_v3 = vld [vmem:[%s1487_s1 + $0xf8] sm:$0xff]  ;;  %427 = vmatpush.bf16.msra.mxu2 %v1064_v2  ;;  %v1071_v7 = vld [vmem:[%s1487_s1 + $0xf0] sm:$0xff]  ;;  %v1070_v11 = vld [vmem:[%s1487_s1 + $0xe8] sm:$0xff] }
   0x5   :  { %456 = vmatpush.bf16.msra.mxu3 %v1072_v3  ;;  %v1045_v12 = vld [vmem:[%s1487_s1 + $0x20] sm:$0xff]  ;;  %v1044_v16 = vld [vmem:[%s1487_s1 + $0x18] sm:$0xff]  ;;  %v1043_v20 = vld [vmem:[%s1487_s1 + $0x10] sm:$0xff] }
   0x6   :  { %370 = vmatpush.bf16.msra.mxu0 %v1047_v4  ;;  %v1053_v13 = vld [vmem:[%s1487_s1 + $0x60] sm:$0xff]  ;;  %v1052_v17 = vld [vmem:[%s1487_s1 + $0x58] sm:$0xff]  ;;  %v1051_v21 = vld [vmem:[%s1487_s1 + $0x50] sm:$0xff] }
   0x7   :  { %399 = vmatpush.bf16.msra.mxu1 %v1055_v5  ;;  %v1061_v14 = vld [vmem:[%s1487_s1 + $0xa0] sm:$0xff]  ;;  %v1060_v18 = vld [vmem:[%s1487_s1 + $0x98] sm:$0xff]  ;;  %v1059_v22 = vld [vmem:[%s1487_s1 + $0x90] sm:$0xff] }
   0x8   :  { %428 = vmatpush.bf16.msra.mxu2 %v1063_v6  ;;  %v1069_v15 = vld [vmem:[%s1487_s1 + $0xe0] sm:$0xff]  ;;  %v1068_v19 = vld [vmem:[%s1487_s1 + $0xd8] sm:$0xff]  ;;  %v1067_v23 = vld [vmem:[%s1487_s1 + $0xd0] sm:$0xff] }
   0x9   :  { %457 = vmatpush.bf16.msra.mxu3 %v1071_v7  ;;  %v1042_v24 = vld [vmem:[%s1487_s1 + $0x8] sm:$0xff]  ;;  %v1041_v28 = vld [vmem:[%s1487_s1] sm:$0xff]  ;;  %v1027_v33 = vld [vmem:[%s1488_s0 + $0xc] sm:$0xf0] }
   0xa   :  { %371 = vmatpush.bf16.msra.mxu0 %v1046_v8  ;;  %v1050_v25 = vld [vmem:[%s1487_s1 + $0x48] sm:$0xff]  ;;  %v1049_v29 = vld [vmem:[%s1487_s1 + $0x40] sm:$0xff]  ;;  %v837_v35 = vld [vmem:[%s1488_s0 + $0x10] sm:$0xf0] }
   0xb   :  { %400 = vmatpush.bf16.msra.mxu1 %v1054_v9  ;;  %v1058_v26 = vld [vmem:[%s1487_s1 + $0x88] sm:$0xff]  ;;  %v1057_v30 = vld [vmem:[%s1487_s1 + $0x80] sm:$0xff]  ;;  %v1028_v37 = vld [vmem:[%s1488_s0 + $0x14] sm:$0xf0] }
   0xc   :  { %429 = vmatpush.bf16.msra.mxu2 %v1062_v10  ;;  %v1066_v27 = vld [vmem:[%s1487_s1 + $0xc8] sm:$0xff]  ;;  %v1065_v31 = vld [vmem:[%s1487_s1 + $0xc0] sm:$0xff]  ;;  %v845_v39 = vld [vmem:[%s1488_s0 + $0x18] sm:$0xf0] }
   0xd   :  { %458 = vmatpush.bf16.msra.mxu3 %v1070_v11  ;;  %v835_v32 = vld [vmem:[%s1488_s0] sm:$0xf]  ;;  %v1025_v34 = vld [vmem:[%s1488_s0 + $0x4] sm:$0xf]  ;;  %v843_v36 = vld [vmem:[%s1488_s0 + $0x8] sm:$0xf] }
   0xe   :  { %372 = vmatpush.bf16.msra.mxu0 %v1045_v12  ;;  %v1026_v38 = vld [vmem:[%s1488_s0 + $0xc] sm:$0xf]  ;;  %v836_v40 = vor.u32 %v1027_v33, %v835_v32  ;;  %v840_v41 = vor.u32 %v1025_v34, %v837_v35  ;;  %v844_v42 = vor.u32 %v1028_v37, %v843_v36  ;;  %v851_v44 = vld [vmem:[%s1488_s0 + $0x20] sm:$0xf]  ;;  %v1031_v45 = vld [vmem:[%s1488_s0 + $0x2c] sm:$0xf0] }
   0xf   :  { %401 = vmatpush.bf16.msra.mxu1 %v1053_v13  ;;  %v848_v43 = vor.u32 %v1026_v38, %v845_v39  ;;  %v1029_v46 = vld [vmem:[%s1488_s0 + $0x24] sm:$0xf]  ;;  %v853_v47 = vld [vmem:[%s1488_s0 + $0x30] sm:$0xf0]  ;;  %v859_v48 = vld [vmem:[%s1488_s0 + $0x28] sm:$0xf]  ;;  %v852_v52 = vor.u32 %v1031_v45, %v851_v44 }
  0x10   :  { %430 = vmatpush.bf16.msra.mxu2 %v1061_v14  ;;  %v1032_v49 = vld [vmem:[%s1488_s0 + $0x34] sm:$0xf0]  ;;  %v1030_v50 = vld [vmem:[%s1488_s0 + $0x2c] sm:$0xf]  ;;  %v861_v51 = vld [vmem:[%s1488_s0 + $0x38] sm:$0xf0]  ;;  %v856_v53 = vor.u32 %v1029_v46, %v853_v47 }
  0x11   :  { %459 = vmatpush.bf16.msra.mxu3 %v1069_v15  ;;  %v860_v54 = vor.u32 %v1032_v49, %v859_v48  ;;  %v864_v55 = vor.u32 %v1030_v50, %v861_v51  ;;  %v867_v56 = vld [vmem:[%s1488_s0 + $0x40] sm:$0xf]  ;;  %v1035_v57 = vld [vmem:[%s1488_s0 + $0x4c] sm:$0xf0]  ;;  %v1033_v58 = vld [vmem:[%s1488_s0 + $0x44] sm:$0xf] }
  0x12   :  { %373 = vmatpush.bf16.msra.mxu0 %v1044_v16  ;;  %v869_v59 = vld [vmem:[%s1488_s0 + $0x50] sm:$0xf0]  ;;  %v875_v60 = vld [vmem:[%s1488_s0 + $0x48] sm:$0xf]  ;;  %v1036_v61 = vld [vmem:[%s1488_s0 + $0x54] sm:$0xf0]  ;;  %v868_v0 = vor.u32 %v1035_v57, %v867_v56 }
  0x13   :  { %402 = vmatpush.bf16.msra.mxu1 %v1052_v17  ;;  %v1034_v62 = vld [vmem:[%s1488_s0 + $0x4c] sm:$0xf]  ;;  %v877_v63 = vld [vmem:[%s1488_s0 + $0x58] sm:$0xf0]  ;;  %v872_v1 = vor.u32 %v1033_v58, %v869_v59  ;;  %v876_v2 = vor.u32 %v1036_v61, %v875_v60  ;;  %v883_v4 = vld [vmem:[%s1488_s0 + $0x60] sm:$0xf] }
  0x14   :  { %431 = vmatpush.bf16.msra.mxu2 %v1060_v18  ;;  %v880_v3 = vor.u32 %v1034_v62, %v877_v63  ;;  %v1039_v5 = vld [vmem:[%s1488_s0 + $0x6c] sm:$0xf0]  ;;  %v1037_v6 = vld [vmem:[%s1488_s0 + $0x64] sm:$0xf]  ;;  %v885_v7 = vld [vmem:[%s1488_s0 + $0x70] sm:$0xf0] }
  0x15   :  { %460 = vmatpush.bf16.msra.mxu3 %v1068_v19  ;;  %v891_v8 = vld [vmem:[%s1488_s0 + $0x68] sm:$0xf]  ;;  %v1040_v9 = vld [vmem:[%s1488_s0 + $0x74] sm:$0xf0]  ;;  %v1038_v10 = vld [vmem:[%s1488_s0 + $0x6c] sm:$0xf]  ;;  %v884_v12 = vor.u32 %v1039_v5, %v883_v4  ;;  %v888_v13 = vor.u32 %v1037_v6, %v885_v7 }
  0x16   :  { %374 = vmatpush.bf16.msra.mxu0 %v1043_v20  ;;  %v893_v11 = vld [vmem:[%s1488_s0 + $0x78] sm:$0xf0]  ;;  %v892_v14 = vor.u32 %v1040_v9, %v891_v8 }
  0x17   :  { %403 = vmatpush.bf16.msra.mxu1 %v1051_v21  ;;  %v896_v15 = vor.u32 %v1038_v10, %v893_v11 }
  0x18   :  { %432 = vmatpush.bf16.msra.mxu2 %v1059_v22 }
  0x19   :  { %461 = vmatpush.bf16.msra.mxu3 %v1067_v23 }
  0x1a   :  { %375 = vmatpush.bf16.msra.mxu0 %v1042_v24 }
  0x1b   :  { %404 = vmatpush.bf16.msra.mxu1 %v1050_v25 }
  0x1c   :  { %433 = vmatpush.bf16.msra.mxu2 %v1058_v26 }
  0x1d   :  { %462 = vmatpush.bf16.msra.mxu3 %v1066_v27 }
  0x1e   :  { %376 = vmatpush.bf16.msra.mxu0 %v1041_v28 }
  0x1f   :  { %405 = vmatpush.bf16.msra.mxu1 %v1049_v29 }
  0x20   :  { %434 = vmatpush.bf16.msra.mxu2 %v1057_v30 }
  0x21   :  { %463 = vmatpush.bf16.msra.mxu3 %v1065_v31  ;;  %377 = vmatmul.bf16.vlgmr.msra.gmra.mxu0 %v836_v40 }
  0x22   :  { %406 = vmatmul.bf16.vlgmr.msra.gmra.mxu1 %v840_v41 }
  0x23   :  { %435 = vmatmul.bf16.vlgmr.msra.gmra.mxu2 %v844_v42 }
  0x24   :  { %464 = vmatmul.bf16.vlgmr.msra.gmra.mxu3 %v848_v43 }
  0x31   :  { %382 = vmatmul.bf16.gmra.mxu0 %v852_v52 }
  0x32   :  { %411 = vmatmul.bf16.gmra.mxu1 %v856_v53 }
  0x33   :  { %440 = vmatmul.bf16.gmra.mxu2 %v860_v54 }
  0x34   :  { %469 = vmatmul.bf16.gmra.mxu3 %v864_v55 }
  0x41   :  { %387 = vmatmul.bf16.gmra.mxu0 %v868_v0 }
  0x42   :  { %416 = vmatmul.bf16.gmra.mxu1 %v872_v1 }
  0x43   :  { %445 = vmatmul.bf16.gmra.mxu2 %v876_v2 }
  0x44   :  { %474 = vmatmul.bf16.gmra.mxu3 %v880_v3 }
  0x51   :  { %392 = vmatmul.bf16.gmra.mxu0 %v884_v12 }
  0x52   :  { %421 = vmatmul.bf16.gmra.mxu1 %v888_v13 }
  0x53   :  { %450 = vmatmul.bf16.gmra.mxu2 %v892_v14 }
  0x54   :  { %479 = vmatmul.bf16.gmra.mxu3 %v896_v15 }
  0x9e   :  { %v378_v16 = vpop.f32.mrf.mxu0 }
  0x9f   :  { %v407_v17 = vpop.f32.mrf.mxu1 }
  0xa0   :  { %v408_v18 = vadd.f32 %v407_v17, %v378_v16  ;;  %v1116_v16 = vmov 0  }
  0xa1   :  { %1097 = vset.pattern.permute.xlu1 %v1116_v16  ;;  %1098 = vset.pattern.permute.xlu2 %v1116_v16 }
  0xa2   :  { %1099 = vset.pattern.permute.xlu0 %v1116_v16 }
  0xa6   :  { %v436_v19 = vpop.f32.mrf.mxu2  ;;  %v380_v22 = vpop.f32.mrf.mxu0 }
  0xa7   :  { %v465_v20 = vpop.f32.mrf.mxu3  ;;  %v437_v21 = vadd.f32 %v436_v19, %v408_v18  ;;  %v409_v23 = vpop.f32.mrf.mxu1 }
  0xa8   :  { %v410_v26 = vadd.f32 %v409_v23, %v380_v22 }
  0xa9   :  { %v1334_v24 = vadd.f32 %v465_v20, %v437_v21 }
  0xab   :  { %485 = vadd.xlane.f32.xlu0 %v1334_v24  ;;  %v501_v25 = vmul.f32 %v1334_v24, %v1334_v24 }
  0xad   :  { %509 = vadd.xlane.f32.xlu2 %v501_v25 }
  0xae   :  { %v438_v27 = vpop.f32.mrf.mxu2  ;;  %v383_v30 = vpop.f32.mrf.mxu0 }
  0xaf   :  { %v467_v28 = vpop.f32.mrf.mxu3  ;;  %v439_v29 = vadd.f32 %v438_v27, %v410_v26  ;;  %v412_v31 = vpop.f32.mrf.mxu1 }
  0xb0   :  { %v413_v33 = vadd.f32 %v412_v31, %v383_v30 }
  0xb1   :  { %v1339_v32 = vadd.f32 %v467_v28, %v439_v29 }
  0xb3   :  { %487 = vadd.xlane.f32.xlu0 %v1339_v32  ;;  %v502_v40 = vmul.f32 %v1339_v32, %v1339_v32 }
  0xb6   :  { %v441_v34 = vpop.f32.mrf.mxu2  ;;  %v385_v37 = vpop.f32.mrf.mxu0 }
  0xb7   :  { %v470_v35 = vpop.f32.mrf.mxu3  ;;  %v442_v36 = vadd.f32 %v441_v34, %v413_v33  ;;  %v414_v38 = vpop.f32.mrf.mxu1 }
  0xb8   :  { %v415_v41 = vadd.f32 %v414_v38, %v385_v37 }
  0xb9   :  { %v1342_v39 = vadd.f32 %v470_v35, %v442_v36 }
  0xbb   :  { %489 = vadd.xlane.f32.xlu1 %v1342_v39  ;;  %511 = vadd.xlane.f32.xlu0 %v502_v40  ;;  %v503_v48 = vmul.f32 %v1342_v39, %v1342_v39 }
  0xbe   :  { %v443_v42 = vpop.f32.mrf.mxu2  ;;  %v388_v45 = vpop.f32.mrf.mxu0 }
  0xbf   :  { %v472_v43 = vpop.f32.mrf.mxu3  ;;  %v444_v44 = vadd.f32 %v443_v42, %v415_v41  ;;  %v417_v46 = vpop.f32.mrf.mxu1 }
  0xc0   :  { %v418_v49 = vadd.f32 %v417_v46, %v388_v45 }
  0xc1   :  { %v1347_v47 = vadd.f32 %v472_v43, %v444_v44 }
  0xc3   :  { %513 = vadd.xlane.f32.xlu1 %v503_v48  ;;  %v504_v50 = vmul.f32 %v1347_v47, %v1347_v47  ;;  %v565_v48 = vld [vmem:[%s1489_s2] sm:$0xff] }
  0xc5   :  { %515 = vadd.xlane.f32.xlu2 %v504_v50 }
  0xc6   :  { %v446_v51 = vpop.f32.mrf.mxu2  ;;  %v390_v54 = vpop.f32.mrf.mxu0 }
  0xc7   :  { %v475_v52 = vpop.f32.mrf.mxu3  ;;  %v447_v53 = vadd.f32 %v446_v51, %v418_v49  ;;  %v419_v55 = vpop.f32.mrf.mxu1 }
  0xc8   :  { %v420_v58 = vadd.f32 %v419_v55, %v390_v54 }
  0xc9   :  { %v1353_v56 = vadd.f32 %v475_v52, %v447_v53 }
  0xcb   :  { %491 = vadd.xlane.f32.xlu1 %v1347_v47  ;;  %v505_v57 = vmul.f32 %v1353_v56, %v1353_v56 }
  0xcd   :  { %517 = vadd.xlane.f32.xlu0 %v505_v57  ;;  %493 = vadd.xlane.f32.xlu2 %v1353_v56 }
  0xce   :  { %v448_v59 = vpop.f32.mrf.mxu2  ;;  %v393_v62 = vpop.f32.mrf.mxu0 }
  0xcf   :  { %v477_v60 = vpop.f32.mrf.mxu3  ;;  %v449_v61 = vadd.f32 %v448_v59, %v420_v58  ;;  %v422_v63 = vpop.f32.mrf.mxu1 }
  0xd0   :  { %v423_v1 = vadd.f32 %v422_v63, %v393_v62 }
  0xd1   :  { %v1359_v0 = vadd.f32 %v477_v60, %v449_v61 }
  0xd3   :  { %v506_v2 = vmul.f32 %v1359_v0, %v1359_v0 }
  0xd5   :  { %519 = vadd.xlane.f32.xlu1 %v506_v2  ;;  %495 = vadd.xlane.f32.xlu2 %v1359_v0 }
  0xd6   :  { %v451_v3 = vpop.f32.mrf.mxu2  ;;  %v395_v7 = vpop.f32.mrf.mxu0 }
  0xd7   :  { %v480_v4 = vpop.f32.mrf.mxu3  ;;  %v452_v5 = vadd.f32 %v451_v3, %v423_v1  ;;  %v424_v8 = vpop.f32.mrf.mxu1  ;;  %v669_v1 = vld [vmem:[%s1490_s3] sm:$0xff] }
  0xd8   :  { %v425_v10 = vadd.f32 %v424_v8, %v395_v7 }
  0xd9   :  { %v1364_v6 = vadd.f32 %v480_v4, %v452_v5 }
  0xdb   :  { %497 = vadd.xlane.f32.xlu0 %v1364_v6  ;;  %v507_v9 = vmul.f32 %v1364_v6, %v1364_v6 }
  0xdd   :  { %521 = vadd.xlane.f32.xlu2 %v507_v9 }
  0xde   :  { %v453_v11 = vpop.f32.mrf.mxu2 }
  0xdf   :  { %v454_v12 = vadd.f32 %v453_v11, %v425_v10  ;;  %v482_v13 = vpop.f32.mrf.mxu3 }
  0xe1   :  { %v1369_v14 = vadd.f32 %v482_v13, %v454_v12 }
  0xe3   :  { %499 = vadd.xlane.f32.xlu1 %v1369_v14  ;;  %v508_v15 = vmul.f32 %v1369_v14, %v1369_v14 }
  0xe5   :  { %523 = vadd.xlane.f32.xlu0 %v508_v15 }
 0x11e   :  { %v486_v17 = vpop.xlane.xlu0 %485 }
 0x11f   :  { %v525_v18 = vmul.f32 0.055555556, %v486_v17 }
 0x120   :  { %v510_v19 = vpop.xlane.xlu2 %509 }
 0x121   :  { %v541_v20 = vmul.f32 %v525_v18, %v525_v18  ;;  %v533_v21 = vmul.f32 0.055555556, %v510_v19 }
 0x123   :  { %v549_v22 = vsub.f32 %v533_v21, %v541_v20  ;;  %v566_v20 = vld [vmem:[%s1489_s2 + $0x8] sm:$0xff] }
 0x125   :  { %v557_v23 = vmax.f32 %v549_v22, 0.0 }
 0x126   :  { %v488_v25 = vpop.xlane.xlu0 %487 }
 0x127   :  { %v573_v26 = vadd.f32 1e-05, %v557_v23  ;;  %v1374_v27 = vmul.f32 0.055555556, %v488_v25 }
 0x129   :  { %1100 = vrsqrt.f32 %v573_v26  ;;  %v542_v31 = vmul.f32 %v1374_v27, %v1374_v27  ;;  %vm587_vm1 = vweird.f32 %v573_v26 }
 0x12e   :  { %v490_v28 = vpop.xlane.xlu1 %489  ;;  %v512_v29 = vpop.xlane.xlu0 %511 }
 0x12f   :  { %v1101_v30 = vpop.eup %1100  ;;  %v534_v33 = vmul.f32 0.055555556, %v512_v29  ;;  %v1378_v37 = vmul.f32 0.055555556, %v490_v28 }
 0x130   :  { %v582_v34 = vmul.f32 %v1101_v30, %v573_v26  ;;  %vm588_vm0 = vweird.f32 %v1101_v30 }
 0x131   :  { %v550_v35 = vsub.f32 %v534_v33, %v542_v31  ;;  %v543_v44 = vmul.f32 %v1378_v37, %v1378_v37  ;;  %vm589_vm2 = vmor %vm587_vm1, %vm588_vm0  ;;  %v670_v31 = vld [vmem:[%s1490_s3 + $0x8] sm:$0xff] }
 0x132   :  { %v583_v36 = vmul.f32 %v1101_v30, %v582_v34 }
 0x133   :  { %v558_v38 = vmax.f32 %v550_v35, 0.0 }
 0x134   :  { %v584_v40 = vmul.f32 0.5, %v583_v36 }
 0x135   :  { %v574_v41 = vadd.f32 1e-05, %v558_v38 }
 0x136   :  { %v585_v42 = vsub.f32 1.5, %v584_v40  ;;  %v514_v43 = vpop.xlane.xlu1 %513 }
 0x137   :  { %1102 = vrsqrt.f32 %v574_v41  ;;  %v535_v45 = vmul.f32 0.055555556, %v514_v43  ;;  %vm597_vm4 = vweird.f32 %v574_v41 }
 0x138   :  { %v516_v46 = vpop.xlane.xlu2 %515  ;;  %v586_v49 = vmul.f32 %v1101_v30, %v585_v42  ;;  %v567_v42 = vld [vmem:[%s1489_s2 + $0x10] sm:$0xff] }
 0x139   :  { %v551_v50 = vsub.f32 %v535_v45, %v543_v44  ;;  %v536_v2 = vmul.f32 0.055555556, %v516_v46 }
 0x13a   :  { %v590_v51 = vsel %vm589_vm2, %v1101_v30, %v586_v49 }
 0x13b   :  { %v559_v52 = vmax.f32 %v551_v50, 0.0  ;;  %v661_v53 = vmul.f32 %v590_v51, %v565_v48 }
 0x13d   :  { %v1103_v54 = vpop.eup %1102  ;;  %v575_v55 = vadd.f32 1e-05, %v559_v52  ;;  %695 = vperm.xlu1 %1097, %v661_v53   ;;  %v677_v60 = vmul.f32 %v661_v53, %v525_v18 }
 0x13e   :  { %v592_v57 = vmul.f32 %v1103_v54, %v574_v41  ;;  %v492_v58 = vpop.xlane.xlu1 %491  ;;  %vm598_vm3 = vweird.f32 %v1103_v54 }
 0x13f   :  { %1104 = vrsqrt.f32 %v575_v55  ;;  %v1385_v59 = vmul.f32 0.055555556, %v492_v58  ;;  %v685_v10 = vsub.f32 %v669_v1, %v677_v60  ;;  %vm599_vm5 = vmor %vm597_vm4, %vm598_vm3  ;;  %vm607_vm7 = vweird.f32 %v575_v55  ;;  %v671_v58 = vld [vmem:[%s1490_s3 + $0x10] sm:$0xff] }
 0x140   :  { %v593_v61 = vmul.f32 %v1103_v54, %v592_v57  ;;  %v518_v62 = vpop.xlane.xlu0 %517  ;;  %v494_v63 = vpop.xlane.xlu2 %493 }
 0x141   :  { %v544_v3 = vmul.f32 %v1385_v59, %v1385_v59  ;;  %v1392_v4 = vmul.f32 0.055555556, %v494_v63  ;;  %v537_v8 = vmul.f32 0.055555556, %v518_v62 }
 0x142   :  { %v594_v5 = vmul.f32 0.5, %v593_v61 }
 0x143   :  { %v552_v7 = vsub.f32 %v536_v2, %v544_v3  ;;  %v545_v9 = vmul.f32 %v1392_v4, %v1392_v4 }
 0x144   :  { %v595_v11 = vsub.f32 1.5, %v594_v5 }
 0x145   :  { %v1105_v12 = vpop.eup %1104  ;;  %v560_v13 = vmax.f32 %v552_v7, 0.0  ;;  %v553_v15 = vsub.f32 %v537_v8, %v545_v9  ;;  %743 = vperm.xlu1 %1097, %v685_v10   ;;  %v568_v10 = vld [vmem:[%s1489_s2 + $0x18] sm:$0xff] }
 0x146   :  { %v602_v16 = vmul.f32 %v1105_v12, %v575_v55  ;;  %v596_v17 = vmul.f32 %v1103_v54, %v595_v11  ;;  %vm608_vm6 = vweird.f32 %v1105_v12 }
 0x147   :  { %v1396_v18 = vadd.f32 1e-05, %v560_v13  ;;  %v561_v19 = vmax.f32 %v553_v15, 0.0  ;;  %vm609_vm8 = vmor %vm607_vm7, %vm608_vm6 }
 0x148   :  { %v603_v21 = vmul.f32 %v1105_v12, %v602_v16  ;;  %v496_v22 = vpop.xlane.xlu2 %495  ;;  %v600_v23 = vsel %vm599_vm5, %v1103_v54, %v596_v17  ;;  %v520_v26 = vpop.xlane.xlu1 %519 }
 0x149   :  { %1106 = vrsqrt.f32 %v1396_v18  ;;  %v1402_v25 = vadd.f32 1e-05, %v561_v19  ;;  %v1404_v29 = vmul.f32 0.055555556, %v496_v22  ;;  %v662_v30 = vmul.f32 %v600_v23, %v566_v20  ;;  %v569_v19 = vld [vmem:[%s1489_s2 + $0x20] sm:$0xff] }
 0x14a   :  { %v604_v28 = vmul.f32 0.5, %v603_v21  ;;  %v538_v34 = vmul.f32 0.055555556, %v520_v26  ;;  %vm617_vm10 = vweird.f32 %v1396_v18  ;;  %v672_v26 = vld [vmem:[%s1490_s3 + $0x18] sm:$0xff] }
 0x14b   :  { %1108 = vrsqrt.f32 %v1402_v25  ;;  %v546_v35 = vmul.f32 %v1404_v29, %v1404_v29  ;;  %700 = vperm.xlu2 %1098, %v662_v30   ;;  %v678_v36 = vmul.f32 %v662_v30, %v1374_v27  ;;  %vm627_vm13 = vweird.f32 %v1402_v25 }
 0x14c   :  { %v605_v33 = vsub.f32 1.5, %v604_v28 }
 0x14d   :  { %v554_v38 = vsub.f32 %v538_v34, %v546_v35  ;;  %v686_v41 = vsub.f32 %v670_v31, %v678_v36  ;;  %v673_v34 = vld [vmem:[%s1490_s3 + $0x20] sm:$0xff] }
 0x14e   :  { %v498_v40 = vpop.xlane.xlu0 %497  ;;  %v606_v43 = vmul.f32 %v1105_v12, %v605_v33 }
 0x14f   :  { %v1107_v44 = vpop.eup %1106  ;;  %v1416_v45 = vmul.f32 0.055555556, %v498_v40  ;;  %v562_v48 = vmax.f32 %v554_v38, 0.0  ;;  %748 = vperm.xlu0 %1099, %v686_v41  }
 0x150   :  { %v612_v46 = vmul.f32 %v1107_v44, %v1396_v18  ;;  %v522_v49 = vpop.xlane.xlu2 %521  ;;  %v610_v50 = vsel %vm609_vm8, %v1105_v12, %v606_v43  ;;  %vm618_vm9 = vweird.f32 %v1107_v44 }
 0x151   :  { %v1109_v27 = vpop.eup %1108  ;;  %v547_v51 = vmul.f32 %v1416_v45, %v1416_v45  ;;  %v539_v52 = vmul.f32 0.055555556, %v522_v49  ;;  %v663_v53 = vmul.f32 %v610_v50, %v567_v42  ;;  %v578_v57 = vadd.f32 1e-05, %v562_v48  ;;  %vm619_vm12 = vmor %vm617_vm10, %vm618_vm9 }
 0x152   :  { %v613_v54 = vmul.f32 %v1107_v44, %v612_v46  ;;  %v622_v55 = vmul.f32 %v1109_v27, %v1402_v25  ;;  %vm628_vm11 = vweird.f32 %v1109_v27 }
 0x153   :  { %v555_v60 = vsub.f32 %v539_v52, %v547_v51  ;;  %v679_v61 = vmul.f32 %v663_v53, %v1378_v37  ;;  %1110 = vrsqrt.f32 %v578_v57  ;;  %vm629_vm14 = vmor %vm627_vm13, %vm628_vm11  ;;  %vm637_vm0 = vweird.f32 %v578_v57 }
 0x154   :  { %v614_v62 = vmul.f32 0.5, %v613_v54  ;;  %v623_v63 = vmul.f32 %v1109_v27, %v622_v55  ;;  %v571_v55 = vld [vmem:[%s1489_s2 + $0x30] sm:$0xff] }
 0x155   :  { %v563_v1 = vmax.f32 %v555_v60, 0.0  ;;  %v687_v2 = vsub.f32 %v671_v58, %v679_v61  ;;  %v572_v61 = vld [vmem:[%s1489_s2 + $0x38] sm:$0xff] }
 0x156   :  { %v615_v3 = vsub.f32 1.5, %v614_v62  ;;  %v624_v5 = vmul.f32 0.5, %v623_v63  ;;  %v500_v7 = vpop.xlane.xlu1 %499 }
 0x157   :  { %v579_v8 = vadd.f32 1e-05, %v563_v1  ;;  %v1426_v9 = vmul.f32 0.055555556, %v500_v7  ;;  %753 = vperm.xlu2 %1098, %v687_v2   ;;  %705 = vperm.xlu0 %1099, %v663_v53  }
 0x158   :  { %v616_v11 = vmul.f32 %v1107_v44, %v615_v3  ;;  %v625_v37 = vsub.f32 1.5, %v624_v5  ;;  %v524_v12 = vpop.xlane.xlu0 %523  ;;  %v676_v3 = vld [vmem:[%s1490_s3 + $0x38] sm:$0xff]  ;;  %v675_v5 = vld [vmem:[%s1490_s3 + $0x30] sm:$0xff] }
 0x159   :  { %1112 = vrsqrt.f32 %v579_v8  ;;  %v548_v13 = vmul.f32 %v1426_v9, %v1426_v9  ;;  %v540_v15 = vmul.f32 0.055555556, %v524_v12  ;;  %v1111_v16 = vpop.eup %1110  ;;  %vm647_vm3 = vweird.f32 %v579_v8 }
 0x15a   :  { %v620_v17 = vsel %vm619_vm12, %v1107_v44, %v616_v11  ;;  %v626_v20 = vmul.f32 %v1109_v27, %v625_v37  ;;  %v632_v21 = vmul.f32 %v1111_v16, %v578_v57  ;;  %vm638_vm15 = vweird.f32 %v1111_v16  ;;  %v570_v44 = vld [vmem:[%s1489_s2 + $0x28] sm:$0xff] }
 0x15b   :  { %v664_v18 = vmul.f32 %v620_v17, %v568_v10  ;;  %v556_v22 = vsub.f32 %v540_v15, %v548_v13  ;;  %vm639_vm1 = vmor %vm637_vm0, %vm638_vm15  ;;  %v674_v37 = vld [vmem:[%s1490_s3 + $0x28] sm:$0xff] }
 0x15c   :  { %v630_v23 = vsel %vm629_vm14, %v1109_v27, %v626_v20  ;;  %v633_v31 = vmul.f32 %v1111_v16, %v632_v21 }
 0x15d   :  { %v680_v28 = vmul.f32 %v664_v18, %v1385_v59  ;;  %v665_v30 = vmul.f32 %v630_v23, %v569_v19  ;;  %v564_v33 = vmax.f32 %v556_v22, 0.0 }
 0x15e   :  { %v634_v36 = vmul.f32 0.5, %v633_v31 }
 0x15f   :  { %v1113_v35 = vpop.eup %1112  ;;  %v681_v25 = vmul.f32 %v665_v30, %v1392_v4  ;;  %v580_v38 = vadd.f32 1e-05, %v564_v33  ;;  %710 = vperm.xlu2 %1098, %v664_v18   ;;  %v688_v40 = vsub.f32 %v672_v26, %v680_v28 }
 0x160   :  { %v642_v41 = vmul.f32 %v1113_v35, %v579_v8  ;;  %v635_v42 = vsub.f32 1.5, %v634_v36  ;;  %vm648_vm2 = vweird.f32 %v1113_v35 }
 0x161   :  { %1114 = vrsqrt.f32 %v580_v38  ;;  %758 = vperm.xlu1 %1097, %v688_v40   ;;  %v689_v59 = vsub.f32 %v673_v34, %v681_v25  ;;  %vm649_vm4 = vmor %vm647_vm3, %vm648_vm2  ;;  %vm657_vm6 = vweird.f32 %v580_v38 }
 0x162   :  { %v643_v43 = vmul.f32 %v1113_v35, %v642_v41  ;;  %v636_v46 = vmul.f32 %v1111_v16, %v635_v42 }
 0x163   :  { %763 = vperm.xlu0 %1099, %v689_v59  }
 0x164   :  { %v644_v4 = vmul.f32 0.5, %v643_v43  ;;  %v640_v48 = vsel %vm639_vm1, %v1111_v16, %v636_v46 }
 0x165   :  { %v666_v49 = vmul.f32 %v640_v48, %v570_v44 }
 0x166   :  { %v645_v50 = vsub.f32 1.5, %v644_v4 }
 0x167   :  { %v1115_v27 = vpop.eup %1114  ;;  %720 = vperm.xlu2 %1098, %v666_v49   ;;  %v682_v8 = vmul.f32 %v666_v49, %v1404_v29 }
 0x168   :  { %v652_v51 = vmul.f32 %v1115_v27, %v580_v38  ;;  %v646_v52 = vmul.f32 %v1113_v35, %v645_v50  ;;  %vm658_vm5 = vweird.f32 %v1115_v27 }
 0x169   :  { %715 = vperm.xlu1 %1097, %v665_v30   ;;  %vm659_vm7 = vmor %vm657_vm6, %vm658_vm5 }
 0x16a   :  { %v653_v53 = vmul.f32 %v1115_v27, %v652_v51  ;;  %v650_v57 = vsel %vm649_vm4, %v1113_v35, %v646_v52 }
 0x16b   :  { %v667_v60 = vmul.f32 %v650_v57, %v571_v55 }
 0x16c   :  { %v654_v54 = vmul.f32 0.5, %v653_v53 }
 0x16d   :  { %v683_v2 = vmul.f32 %v667_v60, %v1416_v45  ;;  %v690_v45 = vsub.f32 %v674_v37, %v682_v8 }
 0x16e   :  { %v655_v58 = vsub.f32 1.5, %v654_v54 }
 0x16f   :  { %v691_v11 = vsub.f32 %v675_v5, %v683_v2 }
 0x170   :  { %v656_v62 = vmul.f32 %v1115_v27, %v655_v58 }
 0x171   :  { %725 = vperm.xlu1 %1097, %v667_v60  }
 0x172   :  { %v660_v63 = vsel %vm659_vm7, %v1115_v27, %v656_v62 }
 0x173   :  { %v668_v1 = vmul.f32 %v660_v63, %v572_v61 }
 0x175   :  { %730 = vperm.xlu2 %1098, %v668_v1   ;;  %v684_v7 = vmul.f32 %v668_v1, %v1426_v9 }
 0x177   :  { %v692_v10 = vsub.f32 %v676_v3, %v684_v7 }
 0x179   :  { %778 = vperm.xlu0 %1099, %v692_v10   ;;  %773 = vperm.xlu1 %1097, %v691_v11  }
 0x17d   :  { %768 = vperm.xlu2 %1098, %v690_v45  }
 0x1a5   :  { %v701_v12 = vpop.permute.xlu2 %700 }
 0x1a6   :  { %v734_v29 = vmul.f32 %v701_v12, %v1339_v32 }
 0x1af   :  { %v696_v13 = vpop.permute.xlu1 %695 }
 0x1b0   :  { %v733_v17 = vmul.f32 %v696_v13, %v1334_v24 }
 0x1b1   :  { %v754_v15 = vpop.permute.xlu2 %753 }
 0x1b7   :  { %v744_v16 = vpop.permute.xlu1 %743 }
 0x1b8   :  { %v781_v9 = vadd.f32 %v744_v16, %v733_v17 }
 0x1b9   :  { %v711_v19 = vpop.permute.xlu2 %710 }
 0x1ba   :  { %v797_v18 = vmul.f32 0.2, %v781_v9  ;;  %vm789_vm8 = vcmp.gt.f32.partialorder %v781_v9, 0.0  ;;  %v736_v32 = vmul.f32 %v711_v19, %v1347_v47 }
 0x1bc   :  { %v805_v23 = vsel %vm789_vm8, %v781_v9, %v797_v18 }
 0x1c1   :  { %v749_v20 = vpop.permute.xlu0 %748  ;;  %v721_v28 = vpop.permute.xlu2 %720 }
 0x1c2   :  { %v782_v21 = vadd.f32 %v749_v20, %v734_v29  ;;  %v738_v41 = vmul.f32 %v721_v28, %v1359_v0 }
 0x1c4   :  { %vm790_vm9 = vcmp.gt.f32.partialorder %v782_v21, 0.0  ;;  %v798_v22 = vmul.f32 0.2, %v782_v21 }
 0x1c6   :  { %v806_v26 = vsel %vm790_vm9, %v782_v21, %v798_v22 }
 0x1c7   :  { %v1076_v30 = vpack.c.bf16 %v806_v26, %v805_v23 }
 0x1c9   :  { %1077 = vst [vmem:[%s1491_s4] sm:$0xff] %v1076_v30   ;;  %v706_v31 = vpop.permute.xlu0 %705 }
 0x1ca   :  { %v735_v24 = vmul.f32 %v706_v31, %v1342_v39 }
 0x1cc   :  { %v783_v34 = vadd.f32 %v754_v15, %v735_v24 }
 0x1ce   :  { %v799_v25 = vmul.f32 0.2, %v783_v34  ;;  %vm791_vm10 = vcmp.gt.f32.partialorder %v783_v34, 0.0 }
 0x1cf   :  { %v731_v33 = vpop.permute.xlu2 %730 }
 0x1d0   :  { %v807_v42 = vsel %vm791_vm10, %v783_v34, %v799_v25  ;;  %v740_v52 = vmul.f32 %v731_v33, %v1369_v14 }
 0x1d3   :  { %v759_v35 = vpop.permute.xlu1 %758 }
 0x1d4   :  { %v784_v36 = vadd.f32 %v759_v35, %v736_v32 }
 0x1d5   :  { %v764_v46 = vpop.permute.xlu0 %763 }
 0x1d6   :  { %vm792_vm11 = vcmp.gt.f32.partialorder %v784_v36, 0.0  ;;  %v800_v38 = vmul.f32 0.2, %v784_v36 }
 0x1d7   :  { %v769_v40 = vpop.permute.xlu2 %768 }
 0x1d8   :  { %v808_v59 = vsel %vm792_vm11, %v784_v36, %v800_v38  ;;  %v786_v44 = vadd.f32 %v769_v40, %v738_v41 }
 0x1d9   :  { %v1081_v43 = vpack.c.bf16 %v808_v59, %v807_v42 }
 0x1da   :  { %v802_v4 = vmul.f32 0.2, %v786_v44  ;;  %vm794_vm12 = vcmp.gt.f32.partialorder %v786_v44, 0.0 }
 0x1db   :  { %1093 = vst [vmem:[%s1491_s4 + $0x8] sm:$0xff] %v1081_v43   ;;  %v716_v39 = vpop.permute.xlu1 %715 }
 0x1dc   :  { %v737_v47 = vmul.f32 %v716_v39, %v1353_v56  ;;  %v810_v50 = vsel %vm794_vm12, %v786_v44, %v802_v4 }
 0x1de   :  { %v785_v48 = vadd.f32 %v764_v46, %v737_v47 }
 0x1e0   :  { %vm793_vm13 = vcmp.gt.f32.partialorder %v785_v48, 0.0  ;;  %v801_v49 = vmul.f32 0.2, %v785_v48 }
 0x1e2   :  { %v809_v27 = vsel %vm793_vm13, %v785_v48, %v801_v49 }
 0x1e3   :  { %v1086_v0 = vpack.c.bf16 %v810_v50, %v809_v27  ;;  %v726_v51 = vpop.permute.xlu1 %725 }
 0x1e4   :  { %v739_v53 = vmul.f32 %v726_v51, %v1364_v6 }
 0x1e5   :  { %1094 = vst [vmem:[%s1491_s4 + $0x10] sm:$0xff] %v1086_v0  }
 0x1eb   :  { %v779_v54 = vpop.permute.xlu0 %778  ;;  %v774_v56 = vpop.permute.xlu1 %773 }
 0x1ec   :  { %v788_v55 = vadd.f32 %v779_v54, %v740_v52  ;;  %v787_v57 = vadd.f32 %v774_v56, %v739_v53 }
 0x1ee   :  { %vm796_vm14 = vcmp.gt.f32.partialorder %v788_v55, 0.0  ;;  %v804_v58 = vmul.f32 0.2, %v788_v55  ;;  %vm795_vm15 = vcmp.gt.f32.partialorder %v787_v57, 0.0  ;;  %v803_v60 = vmul.f32 0.2, %v787_v57 }
 0x1f0   :  { %v812_v61 = vsel %vm796_vm14, %v788_v55, %v804_v58  ;;  %v811_v62 = vsel %vm795_vm15, %v787_v57, %v803_v60 }
 0x1f1   :  { %v1091_v63 = vpack.c.bf16 %v812_v61, %v811_v62 }
 0x1f3   :  { %1095 = vst [vmem:[%s1491_s4 + $0x18] sm:$0xff] %v1091_v63  }

// kernel: discriminator_forward.9
= control target key start
LH: loop header
LB: loop body
LE: loop exit
PB: predicated region body
PF: predicated region fallthrough
CT: control target
= control target key end

     0   :  { %vm320_vm0 = vcmask 523264   ;;  %s719_s1 = inlined_call_operand.vmem [shape: bf16[576,128], index: 1, kind: input, shape index: {}]   ;;  %s720_s0 = inlined_call_operand.vmem [shape: bf16[8,576], index: 0, kind: input, shape index: {}]   ;;  %s721_s2 = inlined_call_operand.vmem [shape: f32[8,128], index: 2, kind: output, shape index: {}]  }
   0x1   :  { %v551_v0 = vld [vmem:[%s719_s1 + $0x38] sm:$0xff]  ;;  %v550_v4 = vld [vmem:[%s719_s1 + $0x30] sm:$0xff]  ;;  %v549_v8 = vld [vmem:[%s719_s1 + $0x28] sm:$0xff] }
   0x2   :  { %v559_v1 = vld [vmem:[%s719_s1 + $0x78] sm:$0xff]  ;;  %324 = vmatpush.bf16.msra.mxu0 %v551_v0  ;;  %v558_v5 = vld [vmem:[%s719_s1 + $0x70] sm:$0xff]  ;;  %v557_v9 = vld [vmem:[%s719_s1 + $0x68] sm:$0xff] }
   0x3   :  { %v567_v2 = vld [vmem:[%s719_s1 + $0xb8] sm:$0xff]  ;;  %337 = vmatpush.bf16.msra.mxu1 %v559_v1  ;;  %v566_v6 = vld [vmem:[%s719_s1 + $0xb0] sm:$0xff]  ;;  %v565_v10 = vld [vmem:[%s719_s1 + $0xa8] sm:$0xff] }
   0x4   :  { %v575_v3 = vld [vmem:[%s719_s1 + $0xf8] sm:$0xff]  ;;  %350 = vmatpush.bf16.msra.mxu2 %v567_v2  ;;  %v574_v7 = vld [vmem:[%s719_s1 + $0xf0] sm:$0xff]  ;;  %v573_v11 = vld [vmem:[%s719_s1 + $0xe8] sm:$0xff] }
   0x5   :  { %363 = vmatpush.bf16.msra.mxu3 %v575_v3  ;;  %v548_v12 = vld [vmem:[%s719_s1 + $0x20] sm:$0xff]  ;;  %v547_v16 = vld [vmem:[%s719_s1 + $0x18] sm:$0xff]  ;;  %v546_v20 = vld [vmem:[%s719_s1 + $0x10] sm:$0xff] }
   0x6   :  { %325 = vmatpush.bf16.msra.mxu0 %v550_v4  ;;  %v556_v13 = vld [vmem:[%s719_s1 + $0x60] sm:$0xff]  ;;  %v555_v17 = vld [vmem:[%s719_s1 + $0x58] sm:$0xff]  ;;  %v554_v21 = vld [vmem:[%s719_s1 + $0x50] sm:$0xff] }
   0x7   :  { %338 = vmatpush.bf16.msra.mxu1 %v558_v5  ;;  %v564_v14 = vld [vmem:[%s719_s1 + $0xa0] sm:$0xff]  ;;  %v563_v18 = vld [vmem:[%s719_s1 + $0x98] sm:$0xff]  ;;  %v562_v22 = vld [vmem:[%s719_s1 + $0x90] sm:$0xff] }
   0x8   :  { %351 = vmatpush.bf16.msra.mxu2 %v566_v6  ;;  %v572_v15 = vld [vmem:[%s719_s1 + $0xe0] sm:$0xff]  ;;  %v571_v19 = vld [vmem:[%s719_s1 + $0xd8] sm:$0xff]  ;;  %v570_v23 = vld [vmem:[%s719_s1 + $0xd0] sm:$0xff] }
   0x9   :  { %364 = vmatpush.bf16.msra.mxu3 %v574_v7  ;;  %v545_v24 = vld [vmem:[%s719_s1 + $0x8] sm:$0xff]  ;;  %v12_v26 = vld [vmem:[%s720_s0] sm:$0xff]  ;;  %v579_v38 = vld [vmem:[%s719_s1 + $0x118] sm:$0xff] }
   0xa   :  { %326 = vmatpush.bf16.msra.mxu0 %v549_v8  ;;  %v553_v25 = vld [vmem:[%s719_s1 + $0x48] sm:$0xff]  ;;  %v90_v30 = vunpack.c.l.b16 %v12_v26  ;;  %v91_v31 = vunpack.c.h.b16 %v12_v26  ;;  %v544_v32 = vld [vmem:[%s719_s1] sm:$0xff]  ;;  %v578_v43 = vld [vmem:[%s719_s1 + $0x110] sm:$0xff] }
   0xb   :  { %339 = vmatpush.bf16.msra.mxu1 %v557_v9  ;;  %v561_v27 = vld [vmem:[%s719_s1 + $0x88] sm:$0xff]  ;;  %v552_v33 = vld [vmem:[%s719_s1 + $0x40] sm:$0xff]  ;;  %v14_v45 = vld [vmem:[%s720_s0 + $0x10] sm:$0xf] }
   0xc   :  { %352 = vmatpush.bf16.msra.mxu2 %v565_v10  ;;  %v569_v28 = vld [vmem:[%s719_s1 + $0xc8] sm:$0xff]  ;;  %v560_v36 = vld [vmem:[%s719_s1 + $0x80] sm:$0xff]  ;;  %v95_v39 = vpack.c.b16 %v90_v30, %v90_v30  ;;  %v96_v40 = vpack.c.b16 %v91_v31, %v91_v31  ;;  %v94_v47 = vunpack.c.l.b16 %v14_v45 }
   0xd   :  { %365 = vmatpush.bf16.msra.mxu3 %v573_v11  ;;  %v13_v29 = vld [vmem:[%s720_s0 + $0x8] sm:$0xff]  ;;  %v568_v37 = vld [vmem:[%s719_s1 + $0xc0] sm:$0xff] }
   0xe   :  { %327 = vmatpush.bf16.msra.mxu0 %v548_v12  ;;  %v92_v34 = vunpack.c.l.b16 %v13_v29  ;;  %v93_v35 = vunpack.c.h.b16 %v13_v29  ;;  %v577_v44 = vld [vmem:[%s719_s1 + $0x108] sm:$0xff]  ;;  %v576_v46 = vld [vmem:[%s719_s1 + $0x100] sm:$0xff]  ;;  %v99_v48 = vpack.c.b16 %v94_v47, %v94_v47 }
   0xf   :  { %340 = vmatpush.bf16.msra.mxu1 %v556_v13 }
  0x10   :  { %353 = vmatpush.bf16.msra.mxu2 %v564_v14  ;;  %v97_v41 = vpack.c.b16 %v92_v34, %v92_v34  ;;  %v98_v42 = vpack.c.b16 %v93_v35, %v93_v35 }
  0x11   :  { %366 = vmatpush.bf16.msra.mxu3 %v572_v15 }
  0x12   :  { %328 = vmatpush.bf16.msra.mxu0 %v547_v16 }
  0x13   :  { %341 = vmatpush.bf16.msra.mxu1 %v555_v17 }
  0x14   :  { %354 = vmatpush.bf16.msra.mxu2 %v563_v18 }
  0x15   :  { %367 = vmatpush.bf16.msra.mxu3 %v571_v19 }
  0x16   :  { %329 = vmatpush.bf16.msra.mxu0 %v546_v20 }
  0x17   :  { %342 = vmatpush.bf16.msra.mxu1 %v554_v21 }
  0x18   :  { %355 = vmatpush.bf16.msra.mxu2 %v562_v22 }
  0x19   :  { %368 = vmatpush.bf16.msra.mxu3 %v570_v23 }
  0x1a   :  { %330 = vmatpush.bf16.msra.mxu0 %v545_v24 }
  0x1b   :  { %343 = vmatpush.bf16.msra.mxu1 %v553_v25 }
  0x1c   :  { %356 = vmatpush.bf16.msra.mxu2 %v561_v27 }
  0x1d   :  { %369 = vmatpush.bf16.msra.mxu3 %v569_v28 }
  0x1e   :  { %331 = vmatpush.bf16.msra.mxu0 %v544_v32 }
  0x1f   :  { %344 = vmatpush.bf16.msra.mxu1 %v552_v33 }
  0x20   :  { %357 = vmatpush.bf16.msra.mxu2 %v560_v36 }
  0x21   :  { %370 = vmatpush.bf16.msra.mxu3 %v568_v37  ;;  %332 = vmatmul.bf16.vlgmr.msra.gmra.mxu0 %v95_v39 }
  0x22   :  { %380 = vmatpush.bf16.msrb.mxu0 %v579_v38  ;;  %345 = vmatmul.bf16.vlgmr.msra.gmra.mxu1 %v96_v40 }
  0x23   :  { %358 = vmatmul.bf16.vlgmr.msra.gmra.mxu2 %v97_v41 }
  0x24   :  { %371 = vmatmul.bf16.vlgmr.msra.gmra.mxu3 %v98_v42 }
  0x26   :  { %381 = vmatpush.bf16.msrb.mxu0 %v578_v43 }
  0x2a   :  { %382 = vmatpush.bf16.msrb.mxu0 %v577_v44 }
  0x2e   :  { %383 = vmatpush.bf16.msrb.mxu0 %v576_v46 }
  0x31   :  { %543 = vmatmul.msk.bf16.vlgmr.msrb.gmra.mxu0 %vm320_vm0, %v99_v48 }
  0x9e   :  { %v333_v49 = vpop.f32.mrf.mxu0 }
  0x9f   :  { %v346_v50 = vpop.f32.mrf.mxu1 }
  0xa0   :  { %v347_v55 = vadd.f32 %v346_v50, %v333_v49 }
  0xa6   :  { %v359_v51 = vpop.f32.mrf.mxu2  ;;  %v335_v53 = vpop.f32.mrf.mxu0 }
  0xa7   :  { %v372_v52 = vpop.f32.mrf.mxu3  ;;  %v348_v54 = vpop.f32.mrf.mxu1  ;;  %v360_v56 = vadd.f32 %v359_v51, %v347_v55 }
  0xa9   :  { %v373_v57 = vadd.f32 %v372_v52, %v360_v56 }
  0xae   :  { %v361_v58 = vpop.f32.mrf.mxu2  ;;  %v385_v60 = vpop.f32.mrf.mxu0 }
  0xaf   :  { %v374_v59 = vpop.f32.mrf.mxu3  ;;  %v386_v61 = vadd.f32 %v385_v60, %v373_v57 }
  0xb1   :  { %v389_v62 = vsub.f32 0.0, %v386_v61 }
  0xb3   :  { %v390_v63 = vmul.f32 1.442695, %v389_v62 }
  0xb5   :  { %580 = vpow2.f32 %v390_v63 }
  0xb6   :  { %v387_v0 = vpop.f32.mrf.mxu0 }
  0xbb   :  { %v581_v1 = vpop.eup %580 }
  0xbc   :  { %v392_v2 = vadd.f32 1.0, %v581_v1 }
  0xbe   :  { %582 = vrcp.f32 %v392_v2 }
  0xc4   :  { %v583_v3 = vpop.eup %582 }
  0xc5   :  { %394 = vst [vmem:[%s721_s2] sm:$0xff] %v583_v3 }

</bundles_post_ra>
